<compile_context>
chip_gen: v7x
topology: tpu7x:2x2x1
jax: 0.10.0
libtpu: 0.0.40
codegen_flags: <defaults>
</compile_context>

<pallas_src>
import functools
import math

import jax
import jax.numpy as jnp
from jax.experimental import pallas as pl
from jax.experimental.pallas import tpu as pltpu


_SQRT_2_OVER_PI = math.sqrt(2.0 / math.pi)

_ROW_ALIGN = 16    # safe sublane multiple for both f32 (8) and bf16 (16) tiles
_TH_ALIGN = 128    # lane width


def mlp_kernel(x_ref, w1_ref, b1_ref, w2_ref, b2_ref, o_ref, acc_ref,
               *, precision=None):
    """One (row-tile, hidden-slab) grid step.

    x_ref : (tm, C)    w1_ref: (C, th)   b1_ref: (1, th)
    w2_ref: (th, C)    b2_ref: (1, C)    o_ref : (tm, C)
    acc_ref: (tm, C) f32 scratch, resident across the H grid axis.
    """
    h_idx = pl.program_id(1)

    @pl.when(h_idx == 0)
    def _init():
        acc_ref[...] = jnp.zeros_like(acc_ref)

    # c_fc slab: (tm, C) @ (C, th) on the MXU, f32 accumulation.
    h = jnp.dot(x_ref[...], w1_ref[...],
                preferred_element_type=jnp.float32, precision=precision)
    h = h + b1_ref[...].astype(jnp.float32)

    # GELU(approximate='tanh') in f32 (VPU + EUP tanh):
    #   0.5 * h * (1 + tanh(sqrt(2/pi) * h * (1 + 0.044715 * h^2)))
    inner = _SQRT_2_OVER_PI * h * (1.0 + 0.044715 * (h * h))
    g = 0.5 * h * (1.0 + jnp.tanh(inner))

    # c_proj slab: accumulate (tm, th) @ (th, C) into the f32 scratch. Cast g
    # down to the weight dtype so bf16 params keep the native MXU path.
    acc_ref[...] += jnp.dot(g.astype(w2_ref.dtype), w2_ref[...],
                            preferred_element_type=jnp.float32,
                            precision=precision)

    @pl.when(h_idx == pl.num_programs(1) - 1)
    def _finalize():
        o_ref[...] = (acc_ref[...] + b2_ref[...].astype(jnp.float32)
                      ).astype(o_ref.dtype)


def _round_up(x, m):
    return ((x + m - 1) // m) * m


def _vmem_capacity_bytes():
    """Physical VMEM per core; device_kind-aware fallback if the query fails."""
    try:
        return int(pltpu.get_tpu_info().vmem_capacity_bytes)
    except Exception:
        pass
    try:
        kind = jax.devices()[0].device_kind.lower()
        if "v7" in kind:
            return 64 * 1024 * 1024
        return 128 * 1024 * 1024          # v5e / v6e
    except Exception:
        return 64 * 1024 * 1024           # most conservative


def _footprint_bytes(tm, th, h_steps, C, x_item, w_item, out_item):
    """Conservative VMEM footprint for one grid step."""
    wbuf = 1 if h_steps == 1 else 2            # constant blocks single-buffered
    weights = wbuf * (C * th + th + th * C) * w_item + C * w_item
    x_bytes = 2 * tm * C * x_item              # x tile, double-buffered
    o_bytes = 2 * tm * C * out_item            # out tile, double-buffered
    acc = tm * C * 4                           # f32 accumulator scratch
    inter = 2 * tm * th * 4                    # h / g f32 intermediates
    return weights + x_bytes + o_bytes + acc + inter


def _choose_tiles(C, H, x_item, w_item, out_item, budget):
    """Pick (tm, th) fitting the VMEM budget; prefer resident weights."""
    tm_cands = (512, 256, 128, 64, 32, 16)     # multiples of 256 first (MXU)
    # 1) weights fully resident (single hidden step).
    for tm in tm_cands:
        if _footprint_bytes(tm, H, 1, C, x_item, w_item, out_item) <= budget:
            return tm, H
    # 2) hidden dimension tiled (needed at GPT widths, esp. v7x 64 MiB VMEM).
    th_cands = [t for t in (4096, 2048, 1024, 512, 256, 128) if t < H]
    for th in th_cands:
        h_steps = pl.cdiv(H, th)
        for tm in tm_cands:
            if _footprint_bytes(tm, th, h_steps, C, x_item, w_item,
                                out_item) <= budget:
                return tm, th
    raise ValueError(
        f"MLP with C={C}, H={H}, weight itemsize={w_item} does not fit the "
        f"VMEM budget ({budget} bytes) even with the smallest tiles; shard or "
        f"quantize the weights.")


def mlp_forward(x, w1, b1, w2, b2, *, tm=None, th=None, precision=None,
                cast_to_bf16=False):
    """x: (B, T, C); w1: (C, H); b1: (H,); w2: (H, C); b2: (C,) with H=4C."""
    B, T, C = x.shape
    H = w1.shape[1]
    M = B * T
    out_dtype = x.dtype

    if cast_to_bf16:
        # Optional mixed-precision feed: bf16 operands into the MXU (~3x MXU
        # throughput on v6e/v7x), f32 accumulation stays.
        x, w1, w2 = (a.astype(jnp.bfloat16) for a in (x, w1, w2))

    vmem_cap = _vmem_capacity_bytes()
    vmem_limit = min(int(vmem_cap * 0.9), 128 * 1024 * 1024)
    budget = int(vmem_limit * 0.8)

    x_item = jnp.dtype(x.dtype).itemsize
    w_item = jnp.dtype(w1.dtype).itemsize
    out_item = jnp.dtype(out_dtype).itemsize

    if tm is None or th is None:
        tm_auto, th_auto = _choose_tiles(C, H, x_item, w_item, out_item, budget)
        tm = tm_auto if tm is None else tm
        th = th_auto if th is None else th

    # Row tile: never larger than the (aligned) row count; keep >= 2 grid steps
    # per v7x TensorCore (>= 4 total) when there is enough work, and prefer an
    # even M-step count so the two cores stay balanced.
    tm = max(_ROW_ALIGN, min(_round_up(tm, _ROW_ALIGN), _round_up(M, _ROW_ALIGN)))
    if M > _ROW_ALIGN:
        target_steps = 4 if M >= 4 * _ROW_ALIGN else 2
        if pl.cdiv(M, tm) < target_steps:
            tm = max(_ROW_ALIGN, _round_up(pl.cdiv(M, target_steps), _ROW_ALIGN))
        m_steps = pl.cdiv(M, tm)
        if m_steps > 1 and m_steps % 2 == 1:
            tm_even = max(_ROW_ALIGN,
                          _round_up(pl.cdiv(M, m_steps + 1), _ROW_ALIGN))
            if pl.cdiv(M, tm_even) % 2 == 0:
                tm = tm_even

    # Hidden tile: lane-aligned, never larger than (aligned) H.
    th = max(_TH_ALIGN, min(_round_up(th, _TH_ALIGN), _round_up(H, _TH_ALIGN)))
    H_pad = _round_up(H, th)
    h_steps = H_pad // th

    M_pad = _round_up(M, tm)
    m_steps = M_pad // tm
    grid = (m_steps, h_steps)

    x2d = x.reshape(M, C)
    if M_pad != M:
        x2d = jnp.pad(x2d, ((0, M_pad - M), (0, 0)))

    w1p, b1p, w2p = w1, b1, w2
    if H_pad != H:
        # Zero-padded hidden columns give h=0 -> gelu(0)=0 -> zero contribution.
        w1p = jnp.pad(w1, ((0, 0), (0, H_pad - H)))
        b1p = jnp.pad(b1, ((0, H_pad - H),))
        w2p = jnp.pad(w2, ((0, H_pad - H), (0, 0)))

    b1_2d = b1p.reshape(1, H_pad)
    b2_2d = b2.reshape(1, C)

    def _spec(shape, index_map, mode=None):
        if mode is None:
            return pl.BlockSpec(shape, index_map)
        return pl.BlockSpec(shape, index_map, pipeline_mode=mode)

    def build_specs(use_single_buffer):
        single = pl.Buffered(1)
        # W1/b1/W2 are grid-invariant only when H is not tiled; b2 always is.
        wm = single if (use_single_buffer and h_steps == 1) else None
        bm = single if use_single_buffer else None
        return [
            _spec((tm, C), lambda i, h: (i, 0)),        # x rows tile
            _spec((C, th), lambda i, h: (0, h), wm),    # W1 slab
            _spec((1, th), lambda i, h: (0, h), wm),    # b1 slab
            _spec((th, C), lambda i, h: (h, 0), wm),    # W2 slab
            _spec((1, C), lambda i, h: (0, 0), bm),     # b2 (constant)
        ]

    kernel = functools.partial(mlp_kernel, precision=precision)

    def run(use_single_buffer):
        return pl.pallas_call(
            kernel,
            out_shape=jax.ShapeDtypeStruct((M_pad, C), out_dtype),
            grid_spec=pltpu.PrefetchScalarGridSpec(
                num_scalar_prefetch=0,
                grid=grid,
                in_specs=build_specs(use_single_buffer),
                out_specs=pl.BlockSpec((tm, C), lambda i, h: (i, 0)),
                scratch_shapes=[pltpu.VMEM((tm, C), jnp.float32)],
            ),
            compiler_params=pltpu.CompilerParams(
                dimension_semantics=("parallel", "arbitrary"),
                vmem_limit_bytes=vmem_limit,
            ),
        )(x2d, w1p, b1_2d, w2p, b2_2d)

    try:
        out2d = run(use_single_buffer=True)
    except Exception:
        # Fallback if pipeline_mode=pl.Buffered(1) is unsupported by the
        # installed JAX/Mosaic; default double-buffering is functionally
        # identical, just spends more VMEM on the constant blocks.
        out2d = run(use_single_buffer=False)

    if M_pad != M:
        out2d = out2d[:M]
    return out2d.reshape(B, T, C)


def mlp_reference(x, w1, b1, w2, b2, precision=None):
    h = jnp.einsum("btc,ch->bth", x, w1, precision=precision) + b1
    g = jax.nn.gelu(h, approximate=True)
    return jnp.einsum("bth,hc->btc", g, w2, precision=precision) + b2


if __name__ == "__main__":
    # Config: n_embd = 32  ->  hidden = 4 * 32 = 128
    B, T, C = 2, 8, 32
    H = 4 * C

    key = jax.random.PRNGKey(0)
    kx, k1, kb1, k2, kb2 = jax.random.split(key, 5)

    x = jax.random.normal(kx, (B, T, C), dtype=jnp.float32)

    # Deterministic parameter init (uniform, a la nn.Linear bounds).
    bound1 = 1.0 / math.sqrt(C)
    bound2 = 1.0 / math.sqrt(H)
    w1 = jax.random.uniform(k1, (C, H), jnp.float32, -bound1, bound1)
    b1 = jax.random.uniform(kb1, (H,), jnp.float32, -bound1, bound1)
    w2 = jax.random.uniform(k2, (H, C), jnp.float32, -bound2, bound2)
    b2 = jax.random.uniform(kb2, (C,), jnp.float32, -bound2, bound2)

    hi = jax.lax.Precision.HIGHEST

    # f32 path (weights resident, single H step).
    out = mlp_forward(x, w1, b1, w2, b2, precision=hi)
    jax.block_until_ready(out)
    ref = mlp_reference(x, w1, b1, w2, b2, precision=hi)
    assert out.shape == (B, T, C)
    assert jnp.allclose(out, ref, atol=1e-5, rtol=1e-5), "f32 mismatch vs reference"

    # Row count not divisible by the tile: exercises padding + multi-step M grid.
    x_odd = jax.random.normal(jax.random.PRNGKey(1), (3, 7, C), dtype=jnp.float32)
    out_odd = mlp_forward(x_odd, w1, b1, w2, b2, precision=hi)
    jax.block_until_ready(out_odd)
    ref_odd = mlp_reference(x_odd, w1, b1, w2, b2, precision=hi)
    assert out_odd.shape == (3, 7, C)
    assert jnp.allclose(out_odd, ref_odd, atol=1e-5, rtol=1e-5), "padded-M mismatch"

    # Hidden-tiled accumulator path (th < H): the config used at GPT widths /
    # on v7x's 64 MiB VMEM, forced here at a small size to exercise the
    # init / accumulate / finalize logic across the H grid axis.
    C2, H2 = 64, 256
    k1b, k2b = jax.random.split(jax.random.PRNGKey(2), 2)
    x2 = jax.random.normal(jax.random.PRNGKey(3), (2, 24, C2), dtype=jnp.float32)
    w1_2 = jax.random.uniform(k1b, (C2, H2), jnp.float32, -0.1, 0.1)
    b1_2 = jnp.full((H2,), 0.01, jnp.float32)
    w2_2 = jax.random.uniform(k2b, (H2, C2), jnp.float32, -0.1, 0.1)
    b2_2 = jnp.full((C2,), -0.02, jnp.float32)
    out_h = mlp_forward(x2, w1_2, b1_2, w2_2, b2_2, th=128, precision=hi)
    jax.block_until_ready(out_h)
    ref_h = mlp_reference(x2, w1_2, b1_2, w2_2, b2_2, precision=hi)
    assert jnp.allclose(out_h, ref_h, atol=1e-5, rtol=1e-5), "H-tiled mismatch"

    # bf16 path: operands feed the MXU natively (f32 accumulation in-kernel).
    xb = x.astype(jnp.bfloat16)
    w1b, b1b = w1.astype(jnp.bfloat16), b1.astype(jnp.bfloat16)
    w2b, b2b = w2.astype(jnp.bfloat16), b2.astype(jnp.bfloat16)
    out_bf = mlp_forward(xb, w1b, b1b, w2b, b2b)
    jax.block_until_ready(out_bf)
    ref_bf = mlp_reference(
        xb.astype(jnp.float32), w1b.astype(jnp.float32), b1b.astype(jnp.float32),
        w2b.astype(jnp.float32), b2b.astype(jnp.float32), precision=hi)
    assert jnp.allclose(out_bf.astype(jnp.float32), ref_bf, atol=1e-1, rtol=1e-1), \
        "bf16 mismatch vs reference"

    print("KERNEL_OK")
</pallas_src>

<mosaic_0001>
module attributes {stable_mosaic.version = 11 : i64} {
  func.func @mlp_kernel(%arg0: i32, %arg1: i32, %arg2: memref<16x32xf32, #tpu.memory_space<vmem>>, %arg3: memref<32x128xf32, #tpu.memory_space<vmem>>, %arg4: memref<1x128xf32, #tpu.memory_space<vmem>>, %arg5: memref<128x32xf32, #tpu.memory_space<vmem>>, %arg6: memref<1x32xf32, #tpu.memory_space<vmem>>, %arg7: memref<16x32xf32, #tpu.memory_space<vmem>>, %arg8: memref<16x32xf32, #tpu.memory_space<vmem>>) attributes {dimension_semantics = [#tpu.dimension_semantics<parallel>, #tpu.dimension_semantics<arbitrary>], iteration_bounds = array<i64: 1, 1>, scalar_prefetch = 0 : i64, scratch_operands = 1 : i64, tpu.core_type = #tpu.core_type<tc>, window_params = [{transform_indices = @transform_0, window_bounds = array<i64: 16, 32>}, {pipeline_mode = #tpu.pipeline_mode<synchronous>, transform_indices = @transform_1, window_bounds = array<i64: 32, 128>}, {pipeline_mode = #tpu.pipeline_mode<synchronous>, transform_indices = @transform_2, window_bounds = array<i64: 1, 128>}, {pipeline_mode = #tpu.pipeline_mode<synchronous>, transform_indices = @transform_3, window_bounds = array<i64: 128, 32>}, {pipeline_mode = #tpu.pipeline_mode<synchronous>, transform_indices = @transform_4, window_bounds = array<i64: 1, 32>}, {transform_indices = @transform_5, window_bounds = array<i64: 16, 32>}]} {
    %c0_i32 = arith.constant 0 : i32
    %0 = arith.cmpi eq, %arg1, %c0_i32 : i32
    %1 = arith.extui %0 : i1 to i32
    %c0_i32_0 = arith.constant 0 : i32
    %2 = arith.cmpi ne, %1, %c0_i32_0 : i32
    scf.if %2 {
      %cst_20 = arith.constant 0.000000e+00 : f32
      %31 = vector.broadcast %cst_20 : f32 to vector<16x32xf32>
      %c0_21 = arith.constant 0 : index
      %c0_22 = arith.constant 0 : index
      %32 = vector.load %arg8[%c0_21, %c0_22] : memref<16x32xf32, #tpu.memory_space<vmem>>, vector<16x32xf32>
      tpu.vector_store %arg8[%c0_21, %c0_22], %31 {strides = array<i32>} : memref<16x32xf32, #tpu.memory_space<vmem>>, vector<16x32xf32>,
    } else {
    }
    %c0 = arith.constant 0 : index
    %c0_1 = arith.constant 0 : index
    %3 = vector.load %arg2[%c0, %c0_1] : memref<16x32xf32, #tpu.memory_space<vmem>>, vector<16x32xf32>
    %c0_2 = arith.constant 0 : index
    %c0_3 = arith.constant 0 : index
    %4 = vector.load %arg3[%c0_2, %c0_3] : memref<32x128xf32, #tpu.memory_space<vmem>>, vector<32x128xf32>
    %cst = arith.constant dense<0.000000e+00> : vector<16x128xf32>
    %5 = tpu.matmul %3, %4, %cst {dimension_numbers = #tpu.dot_dimension_numbers<[1], [0], [0], [1], [0, 0, 1, 1], [], []>, precision = #tpu.contract_precision<fp32>} : vector<16x32xf32>, vector<32x128xf32>, vector<16x128xf32> -> vector<16x128xf32>
    %c0_4 = arith.constant 0 : index
    %c0_5 = arith.constant 0 : index
    %6 = vector.load %arg4[%c0_4, %c0_5] : memref<1x128xf32, #tpu.memory_space<vmem>>, vector<1x128xf32>
    %7 = vector.broadcast %6 : vector<1x128xf32> to vector<16x128xf32>
    %8 = arith.addf %5, %7 : vector<16x128xf32>
    %cst_6 = arith.constant 0.797884583 : f32
    %9 = vector.broadcast %cst_6 : f32 to vector<16x128xf32>
    %10 = arith.mulf %9, %8 : vector<16x128xf32>
    %11 = arith.mulf %8, %8 : vector<16x128xf32>
    %cst_7 = arith.constant 4.471500e-02 : f32
    %12 = vector.broadcast %cst_7 : f32 to vector<16x128xf32>
    %13 = arith.mulf %12, %11 : vector<16x128xf32>
    %cst_8 = arith.constant 1.000000e+00 : f32
    %14 = vector.broadcast %cst_8 : f32 to vector<16x128xf32>
    %15 = arith.addf %14, %13 : vector<16x128xf32>
    %16 = arith.mulf %10, %15 : vector<16x128xf32>
    %cst_9 = arith.constant 5.000000e-01 : f32
    %17 = vector.broadcast %cst_9 : f32 to vector<16x128xf32>
    %18 = arith.mulf %17, %8 : vector<16x128xf32>
    %19 = math.tanh %16 : vector<16x128xf32>
    %cst_10 = arith.constant 1.000000e+00 : f32
    %20 = vector.broadcast %cst_10 : f32 to vector<16x128xf32>
    %21 = arith.addf %20, %19 : vector<16x128xf32>
    %22 = arith.mulf %18, %21 : vector<16x128xf32>
    %c0_11 = arith.constant 0 : index
    %c0_12 = arith.constant 0 : index
    %23 = vector.load %arg8[%c0_11, %c0_12] : memref<16x32xf32, #tpu.memory_space<vmem>>, vector<16x32xf32>
    %c0_13 = arith.constant 0 : index
    %c0_14 = arith.constant 0 : index
    %24 = vector.load %arg5[%c0_13, %c0_14] : memref<128x32xf32, #tpu.memory_space<vmem>>, vector<128x32xf32>
    %cst_15 = arith.constant dense<0.000000e+00> : vector<16x32xf32>
    %25 = tpu.matmul %22, %24, %cst_15 {dimension_numbers = #tpu.dot_dimension_numbers<[1], [0], [0], [1], [0, 0, 1, 1], [], []>, precision = #tpu.contract_precision<fp32>} : vector<16x128xf32>, vector<128x32xf32>, vector<16x32xf32> -> vector<16x32xf32>
    %26 = arith.addf %23, %25 : vector<16x32xf32>
    %c0_16 = arith.constant 0 : index
    %c0_17 = arith.constant 0 : index
    %27 = vector.load %arg8[%c0_16, %c0_17] : memref<16x32xf32, #tpu.memory_space<vmem>>, vector<16x32xf32>
    tpu.vector_store %arg8[%c0_16, %c0_17], %26 {strides = array<i32>} : memref<16x32xf32, #tpu.memory_space<vmem>>, vector<16x32xf32>,
    %c0_i32_18 = arith.constant 0 : i32
    %28 = arith.cmpi eq, %arg1, %c0_i32_18 : i32
    %29 = arith.extui %28 : i1 to i32
    %c0_i32_19 = arith.constant 0 : i32
    %30 = arith.cmpi ne, %29, %c0_i32_19 : i32
    scf.if %30 {
      %c0_20 = arith.constant 0 : index
      %c0_21 = arith.constant 0 : index
      %31 = vector.load %arg8[%c0_20, %c0_21] : memref<16x32xf32, #tpu.memory_space<vmem>>, vector<16x32xf32>
      %c0_22 = arith.constant 0 : index
      %c0_23 = arith.constant 0 : index
      %32 = vector.load %arg6[%c0_22, %c0_23] : memref<1x32xf32, #tpu.memory_space<vmem>>, vector<1x32xf32>
      %33 = vector.broadcast %32 : vector<1x32xf32> to vector<16x32xf32>
      %34 = arith.addf %31, %33 : vector<16x32xf32>
      %c0_24 = arith.constant 0 : index
      %c0_25 = arith.constant 0 : index
      %35 = vector.load %arg7[%c0_24, %c0_25] : memref<16x32xf32, #tpu.memory_space<vmem>>, vector<16x32xf32>
      tpu.vector_store %arg7[%c0_24, %c0_25], %34 {strides = array<i32>} : memref<16x32xf32, #tpu.memory_space<vmem>>, vector<16x32xf32>,
    } else {
    }
    return
  }
  func.func @transform_0(%arg0: i32, %arg1: i32) -> (i32, i32) {
    %c0_i32 = arith.constant 0 : i32
    %c0_i32_0 = arith.constant 0 : i32
    return %arg0, %c0_i32 : i32, i32
  }
  func.func @transform_1(%arg0: i32, %arg1: i32) -> (i32, i32) {
    %c0_i32 = arith.constant 0 : i32
    %c0_i32_0 = arith.constant 0 : i32
    return %c0_i32, %arg1 : i32, i32
  }
  func.func @transform_2(%arg0: i32, %arg1: i32) -> (i32, i32) {
    %c0_i32 = arith.constant 0 : i32
    %c0_i32_0 = arith.constant 0 : i32
    return %c0_i32, %arg1 : i32, i32
  }
  func.func @transform_3(%arg0: i32, %arg1: i32) -> (i32, i32) {
    %c0_i32 = arith.constant 0 : i32
    %c0_i32_0 = arith.constant 0 : i32
    return %arg1, %c0_i32 : i32, i32
  }
  func.func @transform_4(%arg0: i32, %arg1: i32) -> (i32, i32) {
    %c0_i32 = arith.constant 0 : i32
    %c0_i32_0 = arith.constant 0 : i32
    %c0_i32_1 = arith.constant 0 : i32
    return %c0_i32, %c0_i32_0 : i32, i32
  }
  func.func @transform_5(%arg0: i32, %arg1: i32) -> (i32, i32) {
    %c0_i32 = arith.constant 0 : i32
    %c0_i32_0 = arith.constant 0 : i32
    return %arg0, %c0_i32 : i32, i32
  }
}

module attributes {stable_mosaic.version = 11 : i64} {
  func.func @mlp_kernel(%arg0: i32, %arg1: i32, %arg2: memref<16x32xf32, #tpu.memory_space<vmem>>, %arg3: memref<32x128xf32, #tpu.memory_space<vmem>>, %arg4: memref<1x128xf32, #tpu.memory_space<vmem>>, %arg5: memref<128x32xf32, #tpu.memory_space<vmem>>, %arg6: memref<1x32xf32, #tpu.memory_space<vmem>>, %arg7: memref<16x32xf32, #tpu.memory_space<vmem>>, %arg8: memref<16x32xf32, #tpu.memory_space<vmem>>) attributes {dimension_semantics = [#tpu.dimension_semantics<parallel>, #tpu.dimension_semantics<arbitrary>], iteration_bounds = array<i64: 1, 1>, scalar_prefetch = 0 : i64, scratch_operands = 1 : i64, tpu.core_type = #tpu.core_type<tc>, window_params = [{transform_indices = @transform_0, window_bounds = array<i64: 16, 32>}, {transform_indices = @transform_1, window_bounds = array<i64: 32, 128>}, {transform_indices = @transform_2, window_bounds = array<i64: 1, 128>}, {transform_indices = @transform_3, window_bounds = array<i64: 128, 32>}, {pipeline_mode = #tpu.pipeline_mode<synchronous>, transform_indices = @transform_4, window_bounds = array<i64: 1, 32>}, {transform_indices = @transform_5, window_bounds = array<i64: 16, 32>}]} {
    %c0_i32 = arith.constant 0 : i32
    %0 = arith.cmpi eq, %arg1, %c0_i32 : i32
    %1 = arith.extui %0 : i1 to i32
    %c0_i32_0 = arith.constant 0 : i32
    %2 = arith.cmpi ne, %1, %c0_i32_0 : i32
    scf.if %2 {
      %cst_20 = arith.constant 0.000000e+00 : f32
      %31 = vector.broadcast %cst_20 : f32 to vector<16x32xf32>
      %c0_21 = arith.constant 0 : index
      %c0_22 = arith.constant 0 : index
      %32 = vector.load %arg8[%c0_21, %c0_22] : memref<16x32xf32, #tpu.memory_space<vmem>>, vector<16x32xf32>
      tpu.vector_store %arg8[%c0_21, %c0_22], %31 {strides = array<i32>} : memref<16x32xf32, #tpu.memory_space<vmem>>, vector<16x32xf32>,
    } else {
    }
    %c0 = arith.constant 0 : index
    %c0_1 = arith.constant 0 : index
    %3 = vector.load %arg2[%c0, %c0_1] : memref<16x32xf32, #tpu.memory_space<vmem>>, vector<16x32xf32>
    %c0_2 = arith.constant 0 : index
    %c0_3 = arith.constant 0 : index
    %4 = vector.load %arg3[%c0_2, %c0_3] : memref<32x128xf32, #tpu.memory_space<vmem>>, vector<32x128xf32>
    %cst = arith.constant dense<0.000000e+00> : vector<16x128xf32>
    %5 = tpu.matmul %3, %4, %cst {dimension_numbers = #tpu.dot_dimension_numbers<[1], [0], [0], [1], [0, 0, 1, 1], [], []>, precision = #tpu.contract_precision<fp32>} : vector<16x32xf32>, vector<32x128xf32>, vector<16x128xf32> -> vector<16x128xf32>
    %c0_4 = arith.constant 0 : index
    %c0_5 = arith.constant 0 : index
    %6 = vector.load %arg4[%c0_4, %c0_5] : memref<1x128xf32, #tpu.memory_space<vmem>>, vector<1x128xf32>
    %7 = vector.broadcast %6 : vector<1x128xf32> to vector<16x128xf32>
    %8 = arith.addf %5, %7 : vector<16x128xf32>
    %cst_6 = arith.constant 0.797884583 : f32
    %9 = vector.broadcast %cst_6 : f32 to vector<16x128xf32>
    %10 = arith.mulf %9, %8 : vector<16x128xf32>
    %11 = arith.mulf %8, %8 : vector<16x128xf32>
    %cst_7 = arith.constant 4.471500e-02 : f32
    %12 = vector.broadcast %cst_7 : f32 to vector<16x128xf32>
    %13 = arith.mulf %12, %11 : vector<16x128xf32>
    %cst_8 = arith.constant 1.000000e+00 : f32
    %14 = vector.broadcast %cst_8 : f32 to vector<16x128xf32>
    %15 = arith.addf %14, %13 : vector<16x128xf32>
    %16 = arith.mulf %10, %15 : vector<16x128xf32>
    %cst_9 = arith.constant 5.000000e-01 : f32
    %17 = vector.broadcast %cst_9 : f32 to vector<16x128xf32>
    %18 = arith.mulf %17, %8 : vector<16x128xf32>
    %19 = math.tanh %16 : vector<16x128xf32>
    %cst_10 = arith.constant 1.000000e+00 : f32
    %20 = vector.broadcast %cst_10 : f32 to vector<16x128xf32>
    %21 = arith.addf %20, %19 : vector<16x128xf32>
    %22 = arith.mulf %18, %21 : vector<16x128xf32>
    %c0_11 = arith.constant 0 : index
    %c0_12 = arith.constant 0 : index
    %23 = vector.load %arg8[%c0_11, %c0_12] : memref<16x32xf32, #tpu.memory_space<vmem>>, vector<16x32xf32>
    %c0_13 = arith.constant 0 : index
    %c0_14 = arith.constant 0 : index
    %24 = vector.load %arg5[%c0_13, %c0_14] : memref<128x32xf32, #tpu.memory_space<vmem>>, vector<128x32xf32>
    %cst_15 = arith.constant dense<0.000000e+00> : vector<16x32xf32>
    %25 = tpu.matmul %22, %24, %cst_15 {dimension_numbers = #tpu.dot_dimension_numbers<[1], [0], [0], [1], [0, 0, 1, 1], [], []>, precision = #tpu.contract_precision<fp32>} : vector<16x128xf32>, vector<128x32xf32>, vector<16x32xf32> -> vector<16x32xf32>
    %26 = arith.addf %23, %25 : vector<16x32xf32>
    %c0_16 = arith.constant 0 : index
    %c0_17 = arith.constant 0 : index
    %27 = vector.load %arg8[%c0_16, %c0_17] : memref<16x32xf32, #tpu.memory_space<vmem>>, vector<16x32xf32>
    tpu.vector_store %arg8[%c0_16, %c0_17], %26 {strides = array<i32>} : memref<16x32xf32, #tpu.memory_space<vmem>>, vector<16x32xf32>,
    %c0_i32_18 = arith.constant 0 : i32
    %28 = arith.cmpi eq, %arg1, %c0_i32_18 : i32
    %29 = arith.extui %28 : i1 to i32
    %c0_i32_19 = arith.constant 0 : i32
    %30 = arith.cmpi ne, %29, %c0_i32_19 : i32
    scf.if %30 {
      %c0_20 = arith.constant 0 : index
      %c0_21 = arith.constant 0 : index
      %31 = vector.load %arg8[%c0_20, %c0_21] : memref<16x32xf32, #tpu.memory_space<vmem>>, vector<16x32xf32>
      %c0_22 = arith.constant 0 : index
      %c0_23 = arith.constant 0 : index
      %32 = vector.load %arg6[%c0_22, %c0_23] : memref<1x32xf32, #tpu.memory_space<vmem>>, vector<1x32xf32>
      %33 = vector.broadcast %32 : vector<1x32xf32> to vector<16x32xf32>
      %34 = arith.addf %31, %33 : vector<16x32xf32>
      %c0_24 = arith.constant 0 : index
      %c0_25 = arith.constant 0 : index
      %35 = vector.load %arg7[%c0_24, %c0_25] : memref<16x32xf32, #tpu.memory_space<vmem>>, vector<16x32xf32>
      tpu.vector_store %arg7[%c0_24, %c0_25], %34 {strides = array<i32>} : memref<16x32xf32, #tpu.memory_space<vmem>>, vector<16x32xf32>,
    } else {
    }
    return
  }
  func.func @transform_0(%arg0: i32, %arg1: i32) -> (i32, i32) {
    %c0_i32 = arith.constant 0 : i32
    %c0_i32_0 = arith.constant 0 : i32
    return %arg0, %c0_i32 : i32, i32
  }
  func.func @transform_1(%arg0: i32, %arg1: i32) -> (i32, i32) {
    %c0_i32 = arith.constant 0 : i32
    %c0_i32_0 = arith.constant 0 : i32
    return %c0_i32, %arg1 : i32, i32
  }
  func.func @transform_2(%arg0: i32, %arg1: i32) -> (i32, i32) {
    %c0_i32 = arith.constant 0 : i32
    %c0_i32_0 = arith.constant 0 : i32
    return %c0_i32, %arg1 : i32, i32
  }
  func.func @transform_3(%arg0: i32, %arg1: i32) -> (i32, i32) {
    %c0_i32 = arith.constant 0 : i32
    %c0_i32_0 = arith.constant 0 : i32
    return %arg1, %c0_i32 : i32, i32
  }
  func.func @transform_4(%arg0: i32, %arg1: i32) -> (i32, i32) {
    %c0_i32 = arith.constant 0 : i32
    %c0_i32_0 = arith.constant 0 : i32
    %c0_i32_1 = arith.constant 0 : i32
    return %c0_i32, %c0_i32_0 : i32, i32
  }
  func.func @transform_5(%arg0: i32, %arg1: i32) -> (i32, i32) {
    %c0_i32 = arith.constant 0 : i32
    %c0_i32_0 = arith.constant 0 : i32
    return %arg0, %c0_i32 : i32, i32
  }
}

</mosaic_0001>

<bundles_post_ra>
// kernel: tpu_custom_call.1
= control target key start
LH: loop header
LB: loop body
LE: loop exit
PB: predicated region body
PF: predicated region fallthrough
CT: control target
= control target key end

     0   :  { %10 = vsyncpa [#allocation4], 0  ;;  %s2626_s0 = inlined_call_operand.hbm [shape: f32[16,32], index: 0, kind: input, shape index: {}]   ;;  %s2627_s1 = inlined_call_operand.hbm [shape: f32[32,128], index: 1, kind: input, shape index: {}]   ;;  %s2628_s2 = inlined_call_operand.hbm [shape: f32[1,128], index: 2, kind: input, shape index: {}]   ;;  %s2629_s3 = inlined_call_operand.hbm [shape: f32[128,32], index: 3, kind: input, shape index: {}]   ;;  %s2630_s4 = inlined_call_operand.hbm [shape: f32[1,32], index: 4, kind: input, shape index: {}]   ;;  %s2631_s5 = inlined_call_operand.hbm [shape: f32[16,32], index: 5, kind: output, shape index: {}]  }
   0x1   :  { %11 = vsyncpa [#allocation7], 0 }
   0x2   :  { %12 = vsyncpa [#allocation10], 0 }
   0x3   :  { %13 = vsyncpa [#allocation5], 0  ;;  %s2236_s18 = smov [#allocation6]   ;;  %s2237_s20 = smov [#allocation9]  }
   0x4   :  { %s31_s19 = sshll.u32 %s2236_s18, 4  ;;  %s53_s21 = sshll.u32 %s2237_s20, 4  ;;  %s32_s19 = int_to_ptr.vmem [resolvable:$true] %s31_s19  ;;  %s2275_s21 = int_to_ptr.vmem [resolvable:$true] %s53_s21 }
   0x5   :  { %s2096_s24 = scalar_lea.hbm %s2627_s1, 512 }
   0x6   :  { %p2097_p0 = scmp.ne.s32.totalorder %s2627_s1, %s2096_s24  ;;  %p2100_p1 = scmp.lt.u32.totalorder %s2096_s24, %s2627_s1 }
   0x8   :  { %p2102_p2 = pnand %p2100_p1, %p2097_p0 }
   0xa   :  { %2105 = shalt.err (!%p2102_p2)
}
   0xb   :  { %s2106_s29 = scalar_lea.vmem %s32_s19, 512  ;;  %p2111_p4 = scmp.lt.s32.totalorder %s32_s19, %s32_s19 }
   0xc   :  { %p2107_p3 = scmp.ne.s32.totalorder %s32_s19, %s2106_s29  ;;  %p2112_p5 = scmp.lt.s32.totalorder %s2106_s29, %s2106_s29 }
   0xe   :  { %p2113_p6 = por %p2112_p5, %p2111_p4 }
  0x10   :  { %p2114_p7 = pnand %p2113_p6, %p2107_p3 }
  0x12   :  { %2117 = shalt.err (!%p2114_p7)
}
  0x13   :  { %s2238_s30 = smov 128   ;;  %s2239_s6 = smov 8  }
  0x14   :  { %37 = dma.hbm_to_vmem [thread:$0]  %s2627_s1, 512, %s32_s19, [#allocation7], %s2238_s30, %s2238_s30, %s2239_s6  }
  0x15   :  { %s2118_s11 = scalar_lea.hbm %s2629_s3, 2048 }
  0x16   :  { %p2119_p8 = scmp.ne.s32.totalorder %s2629_s3, %s2118_s11  ;;  %p2122_p9 = scmp.lt.u32.totalorder %s2118_s11, %s2629_s3 }
  0x18   :  { %p2124_p10 = pnand %p2122_p9, %p2119_p8 }
  0x1a   :  { %2127 = shalt.err (!%p2124_p10)
}
  0x1b   :  { %s2128_s16 = scalar_lea.vmem %s2275_s21, 2048  ;;  %p2133_p12 = scmp.lt.s32.totalorder %s2275_s21, %s2275_s21 }
  0x1c   :  { %p2129_p11 = scmp.ne.s32.totalorder %s2275_s21, %s2128_s16  ;;  %p2134_p13 = scmp.lt.s32.totalorder %s2128_s16, %s2128_s16 }
  0x1e   :  { %p2135_p0 = por %p2134_p13, %p2133_p12 }
  0x20   :  { %p2136_p1 = pnand %p2135_p0, %p2129_p11 }
  0x22   :  { %2139 = shalt.err (!%p2136_p1)
}
  0x23   :  { %59 = dma.hbm_to_vmem [thread:$0]  %s2629_s3, 2048, %s2275_s21, [#allocation10], %s2238_s30, %s2238_s30, %s2239_s6  }
  0x24   :  { %s2240_s18 = smov [#allocation3]   ;;  %s2241_s20 = smov [#allocation8]  }
  0x25   :  { %s19_s19 = sshll.u32 %s2240_s18, 4  ;;  %s44_s22 = sshll.u32 %s2241_s20, 4  ;;  %s20_s19 = int_to_ptr.vmem [resolvable:$true] %s19_s19  ;;  %s45_s22 = int_to_ptr.vmem [resolvable:$true] %s44_s22 }
  0x26   :  { %s2140_s25 = scalar_lea.hbm %s2626_s0, 256 }
  0x27   :  { %p2141_p2 = scmp.ne.s32.totalorder %s2626_s0, %s2140_s25  ;;  %p2144_p3 = scmp.lt.u32.totalorder %s2140_s25, %s2626_s0 }
  0x29   :  { %p2146_p4 = pnand %p2144_p3, %p2141_p2 }
  0x2b   :  { %2149 = shalt.err (!%p2146_p4)
}
  0x2c   :  { %s2150_s3 = scalar_lea.vmem %s20_s19, 256  ;;  %p2155_p6 = scmp.lt.s32.totalorder %s20_s19, %s20_s19 }
  0x2d   :  { %p2151_p5 = scmp.ne.s32.totalorder %s20_s19, %s2150_s3  ;;  %p2156_p7 = scmp.lt.s32.totalorder %s2150_s3, %s2150_s3 }
  0x2f   :  { %p2157_p8 = por %p2156_p7, %p2155_p6 }
  0x31   :  { %p2158_p9 = pnand %p2157_p8, %p2151_p5 }
  0x33   :  { %2161 = shalt.err (!%p2158_p9)
}
  0x34   :  { %25 = dma.hbm_to_vmem [thread:$0]  %s2626_s0, 256, %s20_s19, [#allocation4], %s2238_s30, %s2238_s30, %s2239_s6  }
  0x35   :  { %s2162_s10 = scalar_lea.hbm %s2628_s2, 16 }
  0x36   :  { %p2163_p10 = scmp.ne.s32.totalorder %s2628_s2, %s2162_s10  ;;  %p2166_p11 = scmp.lt.u32.totalorder %s2162_s10, %s2628_s2 }
  0x38   :  { %p2168_p12 = pnand %p2166_p11, %p2163_p10 }
  0x3a   :  { %2171 = shalt.err (!%p2168_p12)
}
  0x3b   :  { %s2172_s15 = scalar_lea.vmem %s45_s22, 16  ;;  %s2176_s16 = scalar_lea.vmem %s45_s22, 32 }
  0x3c   :  { %p2173_p13 = scmp.ne.s32.totalorder %s45_s22, %s2172_s15  ;;  %p2177_p0 = scmp.lt.s32.totalorder %s45_s22, %s45_s22 }
  0x3d   :  { %p2178_p1 = scmp.lt.s32.totalorder %s2176_s16, %s2172_s15 }
  0x3f   :  { %p2179_p2 = por %p2178_p1, %p2177_p0 }
  0x41   :  { %p2180_p3 = pnand %p2179_p2, %p2173_p13 }
  0x43   :  { %2183 = shalt.err (!%p2180_p3)
}
  0x44   :  { %47 = dma.hbm_to_vmem [thread:$0]  %s2628_s2, 16, %s45_s22, [#allocation7]  }
  0x45   :  { %s2242_s17 = smov [#allocation11]   ;;  %s2184_s23 = scalar_lea.hbm %s2630_s4, 16 }
  0x46   :  { %s66_s18 = sshll.u32 %s2242_s17, 4  ;;  %p2185_p4 = scmp.ne.s32.totalorder %s2630_s4, %s2184_s23  ;;  %s67_s18 = int_to_ptr.vmem [resolvable:$true] %s66_s18 }
  0x47   :  { %p2188_p5 = scmp.lt.u32.totalorder %s2184_s23, %s2630_s4 }
  0x49   :  { %p2190_p6 = pnand %p2188_p5, %p2185_p4 }
  0x4b   :  { %2193 = shalt.err (!%p2190_p6)
}
  0x4c   :  { %s2194_s28 = scalar_lea.vmem %s67_s18, 16  ;;  %s2198_s2 = scalar_lea.vmem %s67_s18, 32 }
  0x4d   :  { %p2195_p7 = scmp.ne.s32.totalorder %s67_s18, %s2194_s28  ;;  %p2199_p8 = scmp.lt.s32.totalorder %s67_s18, %s67_s18 }
  0x4e   :  { %p2200_p9 = scmp.lt.s32.totalorder %s2198_s2, %s2194_s28 }
  0x50   :  { %p2201_p10 = por %p2200_p9, %p2199_p8 }
  0x52   :  { %p2202_p11 = pnand %p2201_p10, %p2195_p7 }
  0x54   :  { %2205 = shalt.err (!%p2202_p11)
}
  0x55   :  { %69 = dma.hbm_to_vmem [thread:$0]  %s2630_s4, 16, %s67_s18, [#allocation10]  }
  0x56   :  { %2228 = dma.done.wait [#allocation4], 256  }
  0x57   :  { %2229 = vsyncadd [#allocation4], 4294967040 }
  0x58   :  { %2230 = dma.done.wait [#allocation7], 528  }
  0x59   :  { %2231 = vsyncadd [#allocation7], 4294966768 }
  0x5a   :  { %2232 = dma.done.wait [#allocation10], 2064  }
  0x5b   :  { %2233 = vsyncadd [#allocation10], 4294965232  ;;  %vm89_vm0 = vcmask 261120   ;;  %v94_v0 = vld [vmem:[#allocation6] sm:$0xff]  ;;  %v95_v1 = vld [vmem:[#allocation6 + $0x8] sm:$0xff]  ;;  %s2244_s4 = smov [#allocation12]  }
  0x5c   :  { %v96_v2 = vld [vmem:[#allocation6 + $0x10] sm:$0xff]  ;;  %v113_v3 = vand.u32 4294901760, %v94_v0  ;;  %v116_v4 = vand.u32 4294901760, %v95_v1  ;;  %v97_v5 = vld [vmem:[#allocation6 + $0x18] sm:$0xff]  ;;  %v2361_v20 = vld [vmem:[#allocation9] sm:$0xff]  ;;  %s1385_s3 = sshll.u32 %s2244_s4, 4  ;;  %s1386_s3 = int_to_ptr.vmem [resolvable:$true] %s1385_s3 }
  0x5d   :  { %v119_v6 = vand.u32 4294901760, %v96_v2  ;;  %v92_v7 = vld [vmem:[#allocation3] sm:$0xff]  ;;  %v93_v8 = vld [vmem:[#allocation3 + $0x8] sm:$0xff]  ;;  %v122_v9 = vand.u32 4294901760, %v97_v5  ;;  %v677_v31 = vand.u32 4294901760, %v2361_v20  ;;  %v664_v60 = vld [vmem:[#allocation9 + $0x20] sm:$0xff]  ;;  %p2211_p13 = scmp.lt.s32.totalorder %s1386_s3, %s1386_s3 }
  0x5e   :  { %v107_v10 = vsel %vm89_vm0, %v92_v7, 0  ;;  %v110_v11 = vsel %vm89_vm0, %v93_v8, 0  ;;  %v2353_v12 = vpack.c.bf16 %v116_v4, %v113_v3  ;;  %v203_v15 = vsub.f32 %v94_v0, %v113_v3  ;;  %v661_v30 = vld [vmem:[#allocation9 + $0x8] sm:$0xff]  ;;  %v662_v54 = vld [vmem:[#allocation9 + $0x10] sm:$0xff]  ;;  %v663_v55 = vld [vmem:[#allocation9 + $0x18] sm:$0xff]  ;;  %s2206_s21 = scalar_lea.vmem %s1386_s3, 256 }
  0x5f   :  { %v2355_v13 = vand.u32 4294901760, %v107_v10  ;;  %v2357_v14 = vand.u32 4294901760, %v110_v11  ;;  %v2359_v16 = vpack.c.bf16 %v122_v9, %v119_v6  ;;  %v210_v17 = vsub.f32 %v95_v1, %v116_v4  ;;  %v665_v61 = vld [vmem:[#allocation9 + $0x28] sm:$0xff]  ;;  %v666_v3 = vld [vmem:[#allocation9 + $0x30] sm:$0xff]  ;;  %v667_v4 = vld [vmem:[#allocation9 + $0x38] sm:$0xff]  ;;  %p2207_p12 = scmp.ne.s32.totalorder %s1386_s3, %s2206_s21  ;;  %p2212_p0 = scmp.lt.s32.totalorder %s2206_s21, %s2206_s21 }
  0x60   :  { %v217_v18 = vsub.f32 %v96_v2, %v119_v6  ;;  %v224_v19 = vsub.f32 %v97_v5, %v122_v9  ;;  %1822 = vmatprep.subr.bf16.mxu0 %v2353_v12  ;;  %v204_v23 = vand.u32 4294901760, %v203_v15  ;;  %v680_v41 = vand.u32 4294901760, %v661_v30 }
  0x61   :  { %v182_v21 = vsub.f32 %v107_v10, %v2355_v13  ;;  %v192_v22 = vsub.f32 %v110_v11, %v2357_v14  ;;  %1824 = vmatpush3.bf16.msra.mxu0 %v2353_v12  ;;  %v211_v24 = vand.u32 4294901760, %v210_v17  ;;  %v2371_v44 = vsub.f32 %v2361_v20, %v677_v31  ;;  %v668_v11 = vld [vmem:[#allocation9 + $0x40] sm:$0xff]  ;;  %v670_v20 = vld [vmem:[#allocation9 + $0x50] sm:$0xff]  ;;  %p2213_p1 = por %p2212_p0, %p2211_p13 }
  0x62   :  { %v218_v25 = vand.u32 4294901760, %v217_v18  ;;  %v225_v26 = vand.u32 4294901760, %v224_v19  ;;  %1826 = vmatprep.subr.bf16.mxu0 %v2359_v16  ;;  %v205_v29 = vsub.f32 %v203_v15, %v204_v23  ;;  %v2373_v47 = vsub.f32 %v661_v30, %v680_v41 }
  0x63   :  { %v183_v27 = vand.u32 4294901760, %v182_v21  ;;  %v193_v28 = vand.u32 4294901760, %v192_v22  ;;  %v212_v32 = vsub.f32 %v210_v17, %v211_v24  ;;  %v1837_v49 = vpack.c.bf16 %v210_v17, %v203_v15  ;;  %p2214_p2 = pnand %p2213_p1, %p2207_p12 }
  0x64   :  { %v219_v33 = vsub.f32 %v217_v18, %v218_v25  ;;  %v226_v34 = vsub.f32 %v224_v19, %v225_v26  ;;  %v206_v37 = vand.u32 4294901760, %v205_v29  ;;  %v1933_v48 = vpack.c.bf16 %v2373_v47, %v2371_v44  ;;  %v675_v29 = vld [vmem:[#allocation9 + $0x78] sm:$0xff] }
  0x65   :  { %v184_v35 = vsub.f32 %v182_v21, %v183_v27  ;;  %v194_v36 = vsub.f32 %v192_v22, %v193_v28  ;;  %1828 = vmatpush3.bf16.msra.mxu0 %v2359_v16  ;;  %v213_v38 = vand.u32 4294901760, %v212_v32  ;;  %v1841_v50 = vpack.c.bf16 %v224_v19, %v217_v18 }
  0x66   :  { %v220_v39 = vand.u32 4294901760, %v219_v33  ;;  %v227_v40 = vand.u32 4294901760, %v226_v34  ;;  %1934 = vmatprep.subr.bf16.mxu1 %v1933_v48  ;;  %v1853_v51 = vpack.c.bf16 %v211_v24, %v204_v23  ;;  %v1857_v52 = vpack.c.bf16 %v225_v26, %v218_v25  ;;  %v673_v26 = vld [vmem:[#allocation9 + $0x68] sm:$0xff] }
  0x67   :  { %v185_v42 = vand.u32 4294901760, %v184_v35  ;;  %v195_v43 = vand.u32 4294901760, %v194_v36  ;;  %v1829_v45 = vpack.c.bf16 %v213_v38, %v206_v37  ;;  %1936 = vmatpush3.bf16.msra.mxu1 %v1933_v48  ;;  %v2389_v53 = vpack.c.bf16 %v680_v41, %v677_v31 }
  0x68   :  { %v1833_v46 = vpack.c.bf16 %v227_v40, %v220_v39  ;;  %v683_v56 = vand.u32 4294901760, %v662_v54  ;;  %v686_v57 = vand.u32 4294901760, %v663_v55  ;;  %v689_v63 = vand.u32 4294901760, %v664_v60 }
  0x69   :  { %1553 = vmatprep.mubr.f32.mxu0 %v185_v42  ;;  %1830 = vmatprep.subr.bf16.mxu0 %v1829_v45  ;;  %v692_v0 = vand.u32 4294901760, %v665_v61  ;;  %v695_v6 = vand.u32 4294901760, %v666_v3  ;;  %v698_v7 = vand.u32 4294901760, %v667_v4  ;;  %v707_v24 = vand.u32 4294901760, %v670_v20 }
  0x6a   :  { %1554 = vmatmul.mubr.f32.vlgmr.msra.gmra.mrb[0].mxu0 %v195_v43  ;;  %v2395_v58 = vsub.f32 %v662_v54, %v683_v56  ;;  %v2397_v59 = vsub.f32 %v663_v55, %v686_v57  ;;  %v2401_v1 = vsub.f32 %v664_v60, %v689_v63  ;;  %v2407_v8 = vpack.c.bf16 %v686_v57, %v683_v56 }
  0x6b   :  { %1832 = vmatpush3.bf16.msra.mxu0 %v1829_v45  ;;  %1564 = vmatprep.mubr.f32.mxu0 %v2355_v13  ;;  %v2403_v2 = vsub.f32 %v665_v61, %v692_v0  ;;  %v2409_v9 = vsub.f32 %v666_v3, %v695_v6  ;;  %v2411_v10 = vsub.f32 %v667_v4, %v698_v7  ;;  %v716_v30 = vand.u32 4294901760, %v673_v26 }
  0x6c   :  { %1834 = vmatprep.subr.bf16.mxu0 %v1833_v46  ;;  %v1937_v62 = vpack.c.bf16 %v2397_v59, %v2395_v58  ;;  %v2423_v19 = vpack.c.bf16 %v698_v7, %v695_v6  ;;  %v722_v32 = vand.u32 4294901760, %v675_v29  ;;  %v2432_v34 = vsub.f32 %v670_v20, %v707_v24 }
  0x6d   :  { %v1941_v5 = vpack.c.bf16 %v2403_v2, %v2401_v1  ;;  %v2438_v37 = vsub.f32 %v673_v26, %v716_v30  ;;  %v780_v48 = vand.u32 4294901760, %v2371_v44  ;;  %v794_v55 = vand.u32 4294901760, %v2395_v58 }
  0x6e   :  { %1938 = vmatprep.subr.bf16.mxu1 %v1937_v62  ;;  %v2444_v40 = vsub.f32 %v675_v29, %v722_v32  ;;  %v801_v56 = vand.u32 4294901760, %v2397_v59 }
  0x6f   :  { %1836 = vmatpush3.bf16.msra.mxu0 %v1833_v46  ;;  %1940 = vmatpush3.bf16.msra.mxu1 %v1937_v62  ;;  %v795_v60 = vsub.f32 %v2395_v58, %v794_v55  ;;  %v822_v58 = vand.u32 4294901760, %v2409_v9 }
  0x70   :  { %1838 = vmatprep.subr.bf16.mxu0 %v1837_v49  ;;  %1942 = vmatprep.subr.bf16.mxu1 %v1941_v5  ;;  %v802_v61 = vsub.f32 %v2397_v59, %v801_v56  ;;  %v829_v59 = vand.u32 4294901760, %v2411_v10 }
  0x71   :  { %v796_v62 = vand.u32 4294901760, %v795_v60 }
  0x72   :  { %1565 = vmatmul.mubr.f32.vlgmr.msra.gmra.mrb[0].mxu0 %v2357_v14 }
  0x73   :  { %1840 = vmatpush3.bf16.msra.mxu0 %v1837_v49  ;;  %1575 = vmatprep.mubr.f32.mxu0 %v182_v21  ;;  %v671_v21 = vld [vmem:[#allocation9 + $0x58] sm:$0xff]  ;;  %v787_v49 = vand.u32 4294901760, %v2373_v47 }
  0x74   :  { %1842 = vmatprep.subr.bf16.mxu0 %v1841_v50  ;;  %1944 = vmatpush3.bf16.msra.mxu1 %v1941_v5  ;;  %v710_v25 = vand.u32 4294901760, %v671_v21 }
  0x76   :  { %v2434_v35 = vsub.f32 %v671_v21, %v710_v25  ;;  %v2449_v42 = vpack.c.bf16 %v710_v25, %v707_v24  ;;  %v850_v24 = vand.u32 4294901760, %v2432_v34 }
  0x77   :  { %1844 = vmatpush3.bf16.msra.mxu0 %v1841_v50  ;;  %v781_v50 = vsub.f32 %v2371_v44, %v780_v48  ;;  %v803_v44 = vand.u32 4294901760, %v802_v61  ;;  %v2521_v61 = vpack.c.bf16 %v829_v59, %v822_v58 }
  0x78   :  { %1846 = vmatprep.subr.bf16.mxu0 %v2353_v12  ;;  %v1953_v38 = vpack.c.bf16 %v2434_v35, %v2432_v34 }
  0x7a   :  { %1576 = vmatmul.mubr.f32.vlgmr.msra.gmra.mrb[0].mxu0 %v192_v22  ;;  %v672_v22 = vld [vmem:[#allocation9 + $0x60] sm:$0xff] }
  0x7b   :  { %1848 = vmatpush3.bf16.msra.mxu0 %v2353_v12  ;;  %1586 = vmatprep.mubr.f32.mxu0 %v183_v27  ;;  %v713_v27 = vand.u32 4294901760, %v672_v22 }
  0x7c   :  { %1850 = vmatprep.subr.bf16.mxu0 %v2359_v16 }
  0x7d   :  { %v2436_v36 = vsub.f32 %v672_v22, %v713_v27  ;;  %v2455_v45 = vpack.c.bf16 %v716_v30, %v713_v27 }
  0x7f   :  { %1852 = vmatpush3.bf16.msra.mxu0 %v2359_v16  ;;  %v1957_v41 = vpack.c.bf16 %v2438_v37, %v2436_v36  ;;  %v864_v29 = vand.u32 4294901760, %v2436_v36 }
  0x80   :  { %1854 = vmatprep.subr.bf16.mxu0 %v1853_v51 }
  0x82   :  { %1587 = vmatmul.mubr.f32.vlgmr.msra.gmra.mrb[0].mxu0 %v193_v28  ;;  %v674_v28 = vld [vmem:[#allocation9 + $0x70] sm:$0xff] }
  0x83   :  { %1856 = vmatpush3.bf16.msra.mxu0 %v1853_v51  ;;  %1597 = vmatprep.mubr.f32.mxu0 %v2355_v13  ;;  %v719_v31 = vand.u32 4294901760, %v674_v28  ;;  %v788_v51 = vsub.f32 %v2373_v47, %v787_v49  ;;  %v808_v47 = vand.u32 4294901760, %v2401_v1 }
  0x84   :  { %1858 = vmatprep.subr.bf16.mxu0 %v1857_v52 }
  0x85   :  { %v2442_v39 = vsub.f32 %v674_v28, %v719_v31  ;;  %v2459_v46 = vpack.c.bf16 %v722_v32, %v719_v31  ;;  %v789_v54 = vand.u32 4294901760, %v788_v51  ;;  %v809_v3 = vsub.f32 %v2401_v1, %v808_v47 }
  0x86   :  { %v2513_v51 = vpack.c.bf16 %v787_v49, %v780_v48 }
  0x87   :  { %1860 = vmatpush3.bf16.msra.mxu0 %v1857_v52  ;;  %v1961_v43 = vpack.c.bf16 %v2444_v40, %v2442_v39  ;;  %v782_v52 = vand.u32 4294901760, %v781_v50  ;;  %v810_v5 = vand.u32 4294901760, %v809_v3 }
  0x88   :  { %1862 = vmatprep.subr.bf16.mxu0 %v2353_v12 }
  0x89   :  { %v2472_v57 = vpack.c.bf16 %v789_v54, %v782_v52 }
  0x8a   :  { %1598 = vmatmul.mubr.f32.vlgmr.msra.gmra.mrb[0].mxu0 %v2357_v14 }
  0x8b   :  { %1864 = vmatpush3.bf16.msra.mxu0 %v2353_v12  ;;  %1608 = vmatprep.mubr.f32.mxu0 %v2355_v13  ;;  %v669_v12 = vld [vmem:[#allocation9 + $0x48] sm:$0xff]  ;;  %v1945_v13 = vpack.c.bf16 %v2411_v10, %v2409_v9 }
  0x8c   :  { %1866 = vmatprep.subr.bf16.mxu0 %v2359_v16  ;;  %v704_v15 = vand.u32 4294901760, %v669_v12 }
  0x8d   :  { %1946 = vmatprep.subr.bf16.mxu1 %v1945_v13 }
  0x8e   :  { %v2421_v18 = vsub.f32 %v669_v12, %v704_v15  ;;  %1948 = vmatpush3.bf16.msra.mxu1 %v1945_v13  ;;  %v830_v12 = vsub.f32 %v2411_v10, %v829_v59  ;;  %v851_v10 = vsub.f32 %v2432_v34, %v850_v24  ;;  %v885_v34 = vand.u32 4294901760, %v2444_v40 }
  0x8f   :  { %1868 = vmatpush3.bf16.msra.mxu0 %v2359_v16  ;;  %v2417_v16 = vpack.c.bf16 %v692_v0, %v689_v63  ;;  %v815_v63 = vand.u32 4294901760, %v2403_v2  ;;  %v2479_v0 = vpack.c.bf16 %v803_v44, %v796_v62 }
  0x90   :  { %1870 = vmatprep.subr.bf16.mxu0 %v2389_v53  ;;  %v843_v1 = vand.u32 4294901760, %v2421_v18  ;;  %v852_v27 = vand.u32 4294901760, %v851_v10  ;;  %v886_v50 = vsub.f32 %v2444_v40, %v885_v34  ;;  %v1399_v40 = vld [vmem:[#allocation8] ss:$0 sm:$0xff] }
  0x91   :  { %v816_v4 = vsub.f32 %v2403_v2, %v815_v63 }
  0x92   :  { %1609 = vmatmul.mubr.f32.vlgmr.msra.gmra.mrb[0].mxu0 %v2357_v14  ;;  %v701_v14 = vand.u32 4294901760, %v668_v11  ;;  %v844_v21 = vsub.f32 %v2421_v18, %v843_v1  ;;  %v887_v54 = vand.u32 4294901760, %v886_v50 }
  0x93   :  { %1872 = vmatpush3.bf16.msra.mxu0 %v2389_v53  ;;  %v817_v6 = vand.u32 4294901760, %v816_v4 }
  0x94   :  { %1874 = vmatprep.subr.bf16.mxu0 %v2407_v8  ;;  %v2419_v17 = vsub.f32 %v668_v11, %v701_v14  ;;  %v2429_v33 = vpack.c.bf16 %v704_v15, %v701_v14  ;;  %v823_v11 = vsub.f32 %v2409_v9, %v822_v58  ;;  %v831_v14 = vand.u32 4294901760, %v830_v12 }
  0x95   :  { %v2485_v7 = vpack.c.bf16 %v817_v6, %v810_v5  ;;  %v857_v9 = vand.u32 4294901760, %v2434_v35 }
  0x96   :  { %v1949_v23 = vpack.c.bf16 %v2421_v18, %v2419_v17  ;;  %v824_v13 = vand.u32 4294901760, %v823_v11  ;;  %v836_v15 = vand.u32 4294901760, %v2419_v17  ;;  %v865_v18 = vsub.f32 %v2436_v36, %v864_v29 }
  0x97   :  { %1876 = vmatpush3.bf16.msra.mxu0 %v2407_v8  ;;  %v858_v26 = vsub.f32 %v2434_v35, %v857_v9  ;;  %v2517_v36 = vpack.c.bf16 %v801_v56, %v794_v55  ;;  %v2525_v44 = vpack.c.bf16 %v857_v9, %v850_v24 }
  0x98   :  { %1878 = vmatprep.subr.bf16.mxu0 %v2417_v16  ;;  %1950 = vmatprep.subr.bf16.mxu1 %v1949_v23  ;;  %v2491_v20 = vpack.c.bf16 %v831_v14, %v824_v13  ;;  %v837_v2 = vsub.f32 %v2419_v17, %v836_v15  ;;  %v871_v17 = vand.u32 4294901760, %v2438_v37  ;;  %v866_v32 = vand.u32 4294901760, %v865_v18 }
  0x99   :  { %1952 = vmatpush3.bf16.msra.mxu1 %v1949_v23  ;;  %v845_v23 = vand.u32 4294901760, %v844_v21  ;;  %v859_v28 = vand.u32 4294901760, %v858_v26  ;;  %v2523_v62 = vpack.c.bf16 %v843_v1, %v836_v15 }
  0x9a   :  { %1954 = vmatprep.subr.bf16.mxu1 %v1953_v38  ;;  %v838_v22 = vand.u32 4294901760, %v837_v2  ;;  %v872_v31 = vsub.f32 %v2438_v37, %v871_v17  ;;  %v2519_v37 = vpack.c.bf16 %v815_v63, %v808_v47  ;;  %v2527_v3 = vpack.c.bf16 %v871_v17, %v864_v29 }
  0x9b   :  { %1880 = vmatpush3.bf16.msra.mxu0 %v2417_v16  ;;  %v2503_v30 = vpack.c.bf16 %v859_v28, %v852_v27 }
  0x9c   :  { %1882 = vmatprep.subr.bf16.mxu0 %v2423_v19  ;;  %v2497_v25 = vpack.c.bf16 %v845_v23, %v838_v22 }
  0x9d   :  { %1956 = vmatpush3.bf16.msra.mxu1 %v1953_v38  ;;  %v873_v38 = vand.u32 4294901760, %v872_v31 }
  0x9e   :  { %1958 = vmatprep.subr.bf16.mxu1 %v1957_v41 }
  0x9f   :  { %1884 = vmatpush3.bf16.msra.mxu0 %v2423_v19 }
  0xa0   :  { %1886 = vmatprep.subr.bf16.mxu0 %v2429_v33 }
  0xa1   :  { %1960 = vmatpush3.bf16.msra.mxu1 %v1957_v41  ;;  %v878_v41 = vand.u32 4294901760, %v2442_v39 }
  0xa2   :  { %1962 = vmatprep.subr.bf16.mxu1 %v1961_v43 }
  0xa3   :  { %1888 = vmatpush3.bf16.msra.mxu0 %v2429_v33  ;;  %v879_v35 = vsub.f32 %v2442_v39, %v878_v41  ;;  %v2529_v39 = vpack.c.bf16 %v885_v34, %v878_v41 }
  0xa4   :  { %1890 = vmatprep.subr.bf16.mxu0 %v2449_v42 }
  0xa5   :  { %1964 = vmatpush3.bf16.msra.mxu1 %v1961_v43  ;;  %v2509_v43 = vpack.c.bf16 %v873_v38, %v866_v32  ;;  %v880_v52 = vand.u32 4294901760, %v879_v35 }
  0xa6   :  { %1966 = vmatprep.subr.bf16.mxu1 %v2389_v53 }
  0xa7   :  { %1892 = vmatpush3.bf16.msra.mxu0 %v2449_v42  ;;  %v2515_v60 = vpack.c.bf16 %v887_v54, %v880_v52 }
  0xa8   :  { %1894 = vmatprep.subr.bf16.mxu0 %v2455_v45 }
  0xab   :  { %1896 = vmatpush3.bf16.msra.mxu0 %v2455_v45 }
  0xac   :  { %1898 = vmatprep.subr.bf16.mxu0 %v2459_v46 }
  0xaf   :  { %1900 = vmatpush3.bf16.msra.mxu0 %v2459_v46 }
  0xb0   :  { %1902 = vmatprep.subr.bf16.mxu0 %v2472_v57 }
 0x165   :  { %v1610_v48 = vpop.f32.mrb[0].mxu0 }
 0x166   :  { %v2061_v49 = vadd.f32 %v1610_v48, %v1399_v40  ;;  %v630_v4 = vpop.f32.mrb[1].mxu0 }
 0x167   :  { %v2062_v5 = vadd.f32 %v1399_v40, %v630_v4 }
 0x168   :  { %v643_v6 = vmul.f32 %v2061_v49, %v2061_v49  ;;  %v641_v63 = vmul.f32 0.7978846, %v2061_v49  ;;  %v651_v1 = vmul.f32 0.5, %v2061_v49 }
 0x169   :  { %v642_v55 = vmul.f32 %v2062_v5, %v2062_v5  ;;  %v640_v59 = vmul.f32 0.7978846, %v2062_v5  ;;  %v650_v21 = vmul.f32 0.5, %v2062_v5 }
 0x16a   :  { %v645_v56 = vmul.f32 0.044715, %v643_v6 }
 0x16b   :  { %v644_v47 = vmul.f32 0.044715, %v642_v55 }
 0x16c   :  { %v647_v58 = vadd.f32 1.0, %v645_v56 }
 0x16d   :  { %v646_v11 = vadd.f32 1.0, %v644_v47 }
 0x16e   :  { %v649_v12 = vmul.f32 %v647_v58, %v641_v63 }
 0x16f   :  { %v648_v13 = vmul.f32 %v646_v11, %v640_v59 }
 0x170   :  { %2092 = vtanh.f32 %v649_v12 }
 0x171   :  { %2094 = vtanh.f32 %v648_v13 }
 0x17a   :  { %v2093_v14 = vpop.eup %2092 }
 0x17b   :  { %v2095_v15 = vpop.eup %2094  ;;  %v655_v2 = vadd.f32 1.0, %v2093_v14 }
 0x17c   :  { %v654_v22 = vadd.f32 1.0, %v2095_v15 }
 0x17d   :  { %v657_v23 = vmul.f32 %v655_v2, %v651_v1 }
 0x17e   :  { %v656_v24 = vmul.f32 %v654_v22, %v650_v21 }
 0x17f   :  { %v2531_v9 = vand.u32 4294901760, %v657_v23 }
 0x180   :  { %v2533_v10 = vand.u32 4294901760, %v656_v24 }
 0x181   :  { %v768_v26 = vsub.f32 %v657_v23, %v2531_v9 }
 0x182   :  { %v758_v27 = vsub.f32 %v656_v24, %v2533_v10 }
 0x183   :  { %v769_v28 = vand.u32 4294901760, %v768_v26 }
 0x184   :  { %1713 = vmatprep.mubr.f32.mxu1 %v758_v27  ;;  %v759_v29 = vand.u32 4294901760, %v758_v27 }
 0x185   :  { %1714 = vmatmul.mubr.f32.vlgmr.msra.gmra.mrb[0].mxu1 %v768_v26  ;;  %v770_v17 = vsub.f32 %v768_v26, %v769_v28 }
 0x186   :  { %1968 = vmatpush3.bf16.msra.mxu1 %v2389_v53  ;;  %1748 = vmatprep.mubr.f32.mxu1 %v759_v29  ;;  %v760_v18 = vsub.f32 %v758_v27, %v759_v29 }
 0x187   :  { %1970 = vmatprep.subr.bf16.mxu1 %v2407_v8  ;;  %v771_v32 = vand.u32 4294901760, %v770_v17 }
 0x188   :  { %v761_v31 = vand.u32 4294901760, %v760_v18 }
 0x18a   :  { %1972 = vmatpush3.bf16.msra.mxu1 %v2407_v8  ;;  %1643 = vmatprep.mubr.f32.mxu0 %v761_v31 }
 0x18b   :  { %1644 = vmatmul.mubr.f32.vlgmr.msra.gmra.mrb[2].mxu0 %v771_v32  ;;  %1974 = vmatprep.subr.bf16.mxu1 %v2417_v16 }
 0x18c   :  { %1904 = vmatpush3.bf16.msra.mxu0 %v2472_v57  ;;  %1678 = vmatprep.mubr.f32.mxu0 %v2533_v10 }
 0x18d   :  { %1906 = vmatprep.subr.bf16.mxu0 %v2479_v0 }
 0x18e   :  { %1976 = vmatpush3.bf16.msra.mxu1 %v2417_v16 }
 0x18f   :  { %1978 = vmatprep.subr.bf16.mxu1 %v2423_v19 }
 0x190   :  { %1908 = vmatpush3.bf16.msra.mxu0 %v2479_v0 }
 0x191   :  { %1910 = vmatprep.subr.bf16.mxu0 %v2485_v7 }
 0x192   :  { %1980 = vmatpush3.bf16.msra.mxu1 %v2423_v19 }
 0x193   :  { %1982 = vmatprep.subr.bf16.mxu1 %v2429_v33 }
 0x194   :  { %1912 = vmatpush3.bf16.msra.mxu0 %v2485_v7 }
 0x195   :  { %1914 = vmatprep.subr.bf16.mxu0 %v2491_v20 }
 0x196   :  { %1984 = vmatpush3.bf16.msra.mxu1 %v2429_v33 }
 0x197   :  { %1986 = vmatprep.subr.bf16.mxu1 %v2449_v42 }
 0x198   :  { %1916 = vmatpush3.bf16.msra.mxu0 %v2491_v20 }
 0x199   :  { %1918 = vmatprep.subr.bf16.mxu0 %v2497_v25 }
 0x19a   :  { %1988 = vmatpush3.bf16.msra.mxu1 %v2449_v42 }
 0x19b   :  { %1990 = vmatprep.subr.bf16.mxu1 %v2455_v45 }
 0x19c   :  { %1920 = vmatpush3.bf16.msra.mxu0 %v2497_v25 }
 0x19d   :  { %1922 = vmatprep.subr.bf16.mxu0 %v2503_v30 }
 0x19e   :  { %1992 = vmatpush3.bf16.msra.mxu1 %v2455_v45 }
 0x19f   :  { %1994 = vmatprep.subr.bf16.mxu1 %v2459_v46 }
 0x1a0   :  { %1924 = vmatpush3.bf16.msra.mxu0 %v2503_v30 }
 0x1a1   :  { %1926 = vmatprep.subr.bf16.mxu0 %v2509_v43 }
 0x1a2   :  { %1996 = vmatpush3.bf16.msra.mxu1 %v2459_v46 }
 0x1a3   :  { %1998 = vmatprep.subr.bf16.mxu1 %v2513_v51 }
 0x1a4   :  { %1928 = vmatpush3.bf16.msra.mxu0 %v2509_v43 }
 0x1a5   :  { %1749 = vmatmul.mubr.f32.vlgmr.msra.gmra.mrb[0].mxu1 %v769_v28  ;;  %1930 = vmatprep.subr.bf16.mxu0 %v2515_v60 }
 0x1a6   :  { %2000 = vmatpush3.bf16.msra.mxu1 %v2513_v51  ;;  %1783 = vmatprep.mubr.f32.mxu1 %v2533_v10 }
 0x1a7   :  { %2002 = vmatprep.subr.bf16.mxu1 %v2517_v36 }
 0x1a8   :  { %1932 = vmatpush3.bf16.msra.mxu0 %v2515_v60 }
 0x1aa   :  { %2004 = vmatpush3.bf16.msra.mxu1 %v2517_v36 }
 0x1ab   :  { %1679 = vmatmul.mubr.f32.vlgmr.msra.gmra.mrb[2].mxu0 %v2531_v9  ;;  %2006 = vmatprep.subr.bf16.mxu1 %v2519_v37 }
 0x1ae   :  { %2008 = vmatpush3.bf16.msra.mxu1 %v2519_v37 }
 0x1af   :  { %2010 = vmatprep.subr.bf16.mxu1 %v2521_v61 }
 0x1b2   :  { %2012 = vmatpush3.bf16.msra.mxu1 %v2521_v61 }
 0x1b3   :  { %2014 = vmatprep.subr.bf16.mxu1 %v2523_v62 }
 0x1b6   :  { %2016 = vmatpush3.bf16.msra.mxu1 %v2523_v62 }
 0x1b7   :  { %2018 = vmatprep.subr.bf16.mxu1 %v2525_v44 }
 0x1ba   :  { %2020 = vmatpush3.bf16.msra.mxu1 %v2525_v44 }
 0x1bb   :  { %2022 = vmatprep.subr.bf16.mxu1 %v2527_v3 }
 0x1be   :  { %2024 = vmatpush3.bf16.msra.mxu1 %v2527_v3 }
 0x1bf   :  { %2026 = vmatprep.subr.bf16.mxu1 %v2529_v39 }
 0x1c2   :  { %2028 = vmatpush3.bf16.msra.mxu1 %v2529_v39 }
 0x1c3   :  { %2030 = vmatprep.subr.bf16.mxu1 %v2389_v53 }
 0x1c5   :  { %1784 = vmatmul.mubr.f32.vlgmr.msra.gmra.mrb[0].mxu1 %v2531_v9 }
 0x1c6   :  { %2032 = vmatpush3.bf16.msra.mxu1 %v2389_v53  ;;  %1818 = vmatprep.mubr.f32.mxu1 %v2533_v10  ;;  %v2243_v53 = vmov 0.0  }
 0x1c7   :  { %2034 = vmatprep.subr.bf16.mxu1 %v2407_v8  ;;  %91 = vst.msk [vmem:[#allocation2 + $0x8] sm:$0xff] %vm89_vm0, %v2243_v53  ;;  %90 = vst.msk [vmem:[#allocation2] sm:$0xff] %vm89_vm0, %v2243_v53 }
 0x1ca   :  { %2036 = vmatpush3.bf16.msra.mxu1 %v2407_v8 }
 0x1cb   :  { %2038 = vmatprep.subr.bf16.mxu1 %v2417_v16 }
 0x1ce   :  { %2040 = vmatpush3.bf16.msra.mxu1 %v2417_v16  ;;  %v658_v57 = vld [vmem:[#allocation2] sm:$0xff] }
 0x1cf   :  { %2042 = vmatprep.subr.bf16.mxu1 %v2423_v19 }
 0x1d2   :  { %2044 = vmatpush3.bf16.msra.mxu1 %v2423_v19  ;;  %v659_v19 = vld [vmem:[#allocation2 + $0x8] sm:$0xff] }
 0x1d3   :  { %2046 = vmatprep.subr.bf16.mxu1 %v2429_v33 }
 0x1d6   :  { %2048 = vmatpush3.bf16.msra.mxu1 %v2429_v33 }
 0x1d7   :  { %2050 = vmatprep.subr.bf16.mxu1 %v2449_v42 }
 0x1da   :  { %2052 = vmatpush3.bf16.msra.mxu1 %v2449_v42 }
 0x1db   :  { %2054 = vmatprep.subr.bf16.mxu1 %v2455_v45 }
 0x1de   :  { %2056 = vmatpush3.bf16.msra.mxu1 %v2455_v45 }
 0x1df   :  { %2058 = vmatprep.subr.bf16.mxu1 %v2459_v46 }
 0x1e2   :  { %2060 = vmatpush3.bf16.msra.mxu1 %v2459_v46  ;;  %v1400_v46 = vld [vmem:[#allocation11] ss:$0 sm:$0xff] }
 0x1e5   :  { %1819 = vmatmul.mubr.f32.vlgmr.msra.gmra.mrb[0].mxu1 %v2531_v9 }
 0x27e   :  { %v1680_v8 = vpop.f32.mrb[2].mxu0 }
 0x27f   :  { %v924_v16 = vpop.f32.mrb[3].mxu0 }
 0x2b8   :  { %v1820_v33 = vpop.f32.mrb[0].mxu1 }
 0x2b9   :  { %v2063_v42 = vadd.f32 %v1820_v33, %v1680_v8  ;;  %v1350_v0 = vpop.f32.mrb[1].mxu1 }
 0x2ba   :  { %v2064_v7 = vadd.f32 %v1350_v0, %v924_v16 }
 0x2bb   :  { %v1361_v45 = vadd.f32 %v2063_v42, %v659_v19 }
 0x2bc   :  { %v1360_v20 = vadd.f32 %v2064_v7, %v658_v57 }
 0x2bd   :  { %1363 = vst.msk [vmem:[#allocation2 + $0x8] sm:$0xff] %vm89_vm0, %v1361_v45 }
 0x2be   :  { %1362 = vst.msk [vmem:[#allocation2] sm:$0xff] %vm89_vm0, %v1360_v20 }
 0x2c4   :  { %v1368_v25 = vld [vmem:[#allocation2 + $0x8] sm:$0xff] }
 0x2c5   :  { %v1367_v30 = vld [vmem:[#allocation2] sm:$0xff]  ;;  %v1377_v38 = vadd.f32 %v1400_v46, %v1368_v25 }
 0x2c6   :  { %v1376_v41 = vadd.f32 %v1400_v46, %v1367_v30 }
 0x2c7   :  { %1379 = vst.msk [vmem:[#allocation12 + $0x8] sm:$0xff] %vm89_vm0, %v1377_v38 }
 0x2c8   :  { %1378 = vst.msk [vmem:[#allocation12] sm:$0xff] %vm89_vm0, %v1376_v41 }
 0x2c9   :  { %2217 = shalt.err (!%p2214_p2)
}
 0x2ca   :  { %s2218_s9 = scalar_lea.hbm %s2631_s5, 256 }
 0x2cb   :  { %p2219_p3 = scmp.ne.s32.totalorder %s2631_s5, %s2218_s9  ;;  %p2222_p4 = scmp.lt.u32.totalorder %s2218_s9, %s2631_s5 }
 0x2cd   :  { %p2224_p5 = pnand %p2222_p4, %p2219_p3 }
 0x2cf   :  { %2227 = shalt.err (!%p2224_p5)
}
 0x2d0   :  { %1391 = dma.vmem_to_hbm [thread:$0]  %s1386_s3, 256, %s2631_s5, [#allocation5], %s2238_s30, %s2238_s30, %s2239_s6  }
 0x2d1   :  { %2234 = dma.done.wait [#allocation5], 256  }
 0x2d2   :  { %2235 = vsyncadd [#allocation5], 4294967040 }
 0x2d3   :  { %1395 = vsyncpa [#allocation4], 1 }
 0x2d4   :  { %1396 = vsyncpa [#allocation7], 1 }
 0x2d5   :  { %1397 = vsyncpa [#allocation10], 1 }
 0x2d6   :  { %1398 = vsyncpa [#allocation5], 1 }

// kernel: tpu_custom_call.1
= control target key start
LH: loop header
LB: loop body
LE: loop exit
PB: predicated region body
PF: predicated region fallthrough
CT: control target
= control target key end

     0   :  { %10 = vsyncpa [#allocation4], 0  ;;  %s2626_s0 = inlined_call_operand.hbm [shape: f32[16,32], index: 0, kind: input, shape index: {}]   ;;  %s2627_s1 = inlined_call_operand.hbm [shape: f32[32,128], index: 1, kind: input, shape index: {}]   ;;  %s2628_s2 = inlined_call_operand.hbm [shape: f32[1,128], index: 2, kind: input, shape index: {}]   ;;  %s2629_s3 = inlined_call_operand.hbm [shape: f32[128,32], index: 3, kind: input, shape index: {}]   ;;  %s2630_s4 = inlined_call_operand.hbm [shape: f32[1,32], index: 4, kind: input, shape index: {}]   ;;  %s2631_s5 = inlined_call_operand.hbm [shape: f32[16,32], index: 5, kind: output, shape index: {}]  }
   0x1   :  { %11 = vsyncpa [#allocation7], 0 }
   0x2   :  { %12 = vsyncpa [#allocation10], 0 }
   0x3   :  { %13 = vsyncpa [#allocation5], 0  ;;  %s2236_s18 = smov [#allocation6]   ;;  %s2237_s20 = smov [#allocation9]  }
   0x4   :  { %s31_s19 = sshll.u32 %s2236_s18, 4  ;;  %s53_s21 = sshll.u32 %s2237_s20, 4  ;;  %s32_s19 = int_to_ptr.vmem [resolvable:$true] %s31_s19  ;;  %s2275_s21 = int_to_ptr.vmem [resolvable:$true] %s53_s21 }
   0x5   :  { %s2096_s24 = scalar_lea.hbm %s2627_s1, 512 }
   0x6   :  { %p2097_p0 = scmp.ne.s32.totalorder %s2627_s1, %s2096_s24  ;;  %p2100_p1 = scmp.lt.u32.totalorder %s2096_s24, %s2627_s1 }
   0x8   :  { %p2102_p2 = pnand %p2100_p1, %p2097_p0 }
   0xa   :  { %2105 = shalt.err (!%p2102_p2)
}
   0xb   :  { %s2106_s29 = scalar_lea.vmem %s32_s19, 512  ;;  %p2111_p4 = scmp.lt.s32.totalorder %s32_s19, %s32_s19 }
   0xc   :  { %p2107_p3 = scmp.ne.s32.totalorder %s32_s19, %s2106_s29  ;;  %p2112_p5 = scmp.lt.s32.totalorder %s2106_s29, %s2106_s29 }
   0xe   :  { %p2113_p6 = por %p2112_p5, %p2111_p4 }
  0x10   :  { %p2114_p7 = pnand %p2113_p6, %p2107_p3 }
  0x12   :  { %2117 = shalt.err (!%p2114_p7)
}
  0x13   :  { %s2238_s30 = smov 128   ;;  %s2239_s6 = smov 8  }
  0x14   :  { %37 = dma.hbm_to_vmem [thread:$0]  %s2627_s1, 512, %s32_s19, [#allocation7], %s2238_s30, %s2238_s30, %s2239_s6  }
  0x15   :  { %s2118_s11 = scalar_lea.hbm %s2629_s3, 2048 }
  0x16   :  { %p2119_p8 = scmp.ne.s32.totalorder %s2629_s3, %s2118_s11  ;;  %p2122_p9 = scmp.lt.u32.totalorder %s2118_s11, %s2629_s3 }
  0x18   :  { %p2124_p10 = pnand %p2122_p9, %p2119_p8 }
  0x1a   :  { %2127 = shalt.err (!%p2124_p10)
}
  0x1b   :  { %s2128_s16 = scalar_lea.vmem %s2275_s21, 2048  ;;  %p2133_p12 = scmp.lt.s32.totalorder %s2275_s21, %s2275_s21 }
  0x1c   :  { %p2129_p11 = scmp.ne.s32.totalorder %s2275_s21, %s2128_s16  ;;  %p2134_p13 = scmp.lt.s32.totalorder %s2128_s16, %s2128_s16 }
  0x1e   :  { %p2135_p0 = por %p2134_p13, %p2133_p12 }
  0x20   :  { %p2136_p1 = pnand %p2135_p0, %p2129_p11 }
  0x22   :  { %2139 = shalt.err (!%p2136_p1)
}
  0x23   :  { %59 = dma.hbm_to_vmem [thread:$0]  %s2629_s3, 2048, %s2275_s21, [#allocation10], %s2238_s30, %s2238_s30, %s2239_s6  }
  0x24   :  { %s2240_s18 = smov [#allocation3]   ;;  %s2241_s20 = smov [#allocation8]  }
  0x25   :  { %s19_s19 = sshll.u32 %s2240_s18, 4  ;;  %s44_s22 = sshll.u32 %s2241_s20, 4  ;;  %s20_s19 = int_to_ptr.vmem [resolvable:$true] %s19_s19  ;;  %s45_s22 = int_to_ptr.vmem [resolvable:$true] %s44_s22 }
  0x26   :  { %s2140_s25 = scalar_lea.hbm %s2626_s0, 256 }
  0x27   :  { %p2141_p2 = scmp.ne.s32.totalorder %s2626_s0, %s2140_s25  ;;  %p2144_p3 = scmp.lt.u32.totalorder %s2140_s25, %s2626_s0 }
  0x29   :  { %p2146_p4 = pnand %p2144_p3, %p2141_p2 }
  0x2b   :  { %2149 = shalt.err (!%p2146_p4)
}
  0x2c   :  { %s2150_s3 = scalar_lea.vmem %s20_s19, 256  ;;  %p2155_p6 = scmp.lt.s32.totalorder %s20_s19, %s20_s19 }
  0x2d   :  { %p2151_p5 = scmp.ne.s32.totalorder %s20_s19, %s2150_s3  ;;  %p2156_p7 = scmp.lt.s32.totalorder %s2150_s3, %s2150_s3 }
  0x2f   :  { %p2157_p8 = por %p2156_p7, %p2155_p6 }
  0x31   :  { %p2158_p9 = pnand %p2157_p8, %p2151_p5 }
  0x33   :  { %2161 = shalt.err (!%p2158_p9)
}
  0x34   :  { %25 = dma.hbm_to_vmem [thread:$0]  %s2626_s0, 256, %s20_s19, [#allocation4], %s2238_s30, %s2238_s30, %s2239_s6  }
  0x35   :  { %s2162_s10 = scalar_lea.hbm %s2628_s2, 16 }
  0x36   :  { %p2163_p10 = scmp.ne.s32.totalorder %s2628_s2, %s2162_s10  ;;  %p2166_p11 = scmp.lt.u32.totalorder %s2162_s10, %s2628_s2 }
  0x38   :  { %p2168_p12 = pnand %p2166_p11, %p2163_p10 }
  0x3a   :  { %2171 = shalt.err (!%p2168_p12)
}
  0x3b   :  { %s2172_s15 = scalar_lea.vmem %s45_s22, 16  ;;  %s2176_s16 = scalar_lea.vmem %s45_s22, 32 }
  0x3c   :  { %p2173_p13 = scmp.ne.s32.totalorder %s45_s22, %s2172_s15  ;;  %p2177_p0 = scmp.lt.s32.totalorder %s45_s22, %s45_s22 }
  0x3d   :  { %p2178_p1 = scmp.lt.s32.totalorder %s2176_s16, %s2172_s15 }
  0x3f   :  { %p2179_p2 = por %p2178_p1, %p2177_p0 }
  0x41   :  { %p2180_p3 = pnand %p2179_p2, %p2173_p13 }
  0x43   :  { %2183 = shalt.err (!%p2180_p3)
}
  0x44   :  { %47 = dma.hbm_to_vmem [thread:$0]  %s2628_s2, 16, %s45_s22, [#allocation7]  }
  0x45   :  { %s2242_s17 = smov [#allocation11]   ;;  %s2184_s23 = scalar_lea.hbm %s2630_s4, 16 }
  0x46   :  { %s66_s18 = sshll.u32 %s2242_s17, 4  ;;  %p2185_p4 = scmp.ne.s32.totalorder %s2630_s4, %s2184_s23  ;;  %s67_s18 = int_to_ptr.vmem [resolvable:$true] %s66_s18 }
  0x47   :  { %p2188_p5 = scmp.lt.u32.totalorder %s2184_s23, %s2630_s4 }
  0x49   :  { %p2190_p6 = pnand %p2188_p5, %p2185_p4 }
  0x4b   :  { %2193 = shalt.err (!%p2190_p6)
}
  0x4c   :  { %s2194_s28 = scalar_lea.vmem %s67_s18, 16  ;;  %s2198_s2 = scalar_lea.vmem %s67_s18, 32 }
  0x4d   :  { %p2195_p7 = scmp.ne.s32.totalorder %s67_s18, %s2194_s28  ;;  %p2199_p8 = scmp.lt.s32.totalorder %s67_s18, %s67_s18 }
  0x4e   :  { %p2200_p9 = scmp.lt.s32.totalorder %s2198_s2, %s2194_s28 }
  0x50   :  { %p2201_p10 = por %p2200_p9, %p2199_p8 }
  0x52   :  { %p2202_p11 = pnand %p2201_p10, %p2195_p7 }
  0x54   :  { %2205 = shalt.err (!%p2202_p11)
}
  0x55   :  { %69 = dma.hbm_to_vmem [thread:$0]  %s2630_s4, 16, %s67_s18, [#allocation10]  }
  0x56   :  { %2228 = dma.done.wait [#allocation4], 256  }
  0x57   :  { %2229 = vsyncadd [#allocation4], 4294967040 }
  0x58   :  { %2230 = dma.done.wait [#allocation7], 528  }
  0x59   :  { %2231 = vsyncadd [#allocation7], 4294966768 }
  0x5a   :  { %2232 = dma.done.wait [#allocation10], 2064  }
  0x5b   :  { %2233 = vsyncadd [#allocation10], 4294965232  ;;  %vm89_vm0 = vcmask 261120   ;;  %v94_v0 = vld [vmem:[#allocation6] sm:$0xff]  ;;  %v95_v1 = vld [vmem:[#allocation6 + $0x8] sm:$0xff]  ;;  %s2244_s4 = smov [#allocation12]  }
  0x5c   :  { %v96_v2 = vld [vmem:[#allocation6 + $0x10] sm:$0xff]  ;;  %v113_v3 = vand.u32 4294901760, %v94_v0  ;;  %v116_v4 = vand.u32 4294901760, %v95_v1  ;;  %v97_v5 = vld [vmem:[#allocation6 + $0x18] sm:$0xff]  ;;  %v2361_v20 = vld [vmem:[#allocation9] sm:$0xff]  ;;  %s1385_s3 = sshll.u32 %s2244_s4, 4  ;;  %s1386_s3 = int_to_ptr.vmem [resolvable:$true] %s1385_s3 }
  0x5d   :  { %v119_v6 = vand.u32 4294901760, %v96_v2  ;;  %v92_v7 = vld [vmem:[#allocation3] sm:$0xff]  ;;  %v93_v8 = vld [vmem:[#allocation3 + $0x8] sm:$0xff]  ;;  %v122_v9 = vand.u32 4294901760, %v97_v5  ;;  %v677_v31 = vand.u32 4294901760, %v2361_v20  ;;  %v664_v60 = vld [vmem:[#allocation9 + $0x20] sm:$0xff]  ;;  %p2211_p13 = scmp.lt.s32.totalorder %s1386_s3, %s1386_s3 }
  0x5e   :  { %v107_v10 = vsel %vm89_vm0, %v92_v7, 0  ;;  %v110_v11 = vsel %vm89_vm0, %v93_v8, 0  ;;  %v2353_v12 = vpack.c.bf16 %v116_v4, %v113_v3  ;;  %v203_v15 = vsub.f32 %v94_v0, %v113_v3  ;;  %v661_v30 = vld [vmem:[#allocation9 + $0x8] sm:$0xff]  ;;  %v662_v54 = vld [vmem:[#allocation9 + $0x10] sm:$0xff]  ;;  %v663_v55 = vld [vmem:[#allocation9 + $0x18] sm:$0xff]  ;;  %s2206_s21 = scalar_lea.vmem %s1386_s3, 256 }
  0x5f   :  { %v2355_v13 = vand.u32 4294901760, %v107_v10  ;;  %v2357_v14 = vand.u32 4294901760, %v110_v11  ;;  %v2359_v16 = vpack.c.bf16 %v122_v9, %v119_v6  ;;  %v210_v17 = vsub.f32 %v95_v1, %v116_v4  ;;  %v665_v61 = vld [vmem:[#allocation9 + $0x28] sm:$0xff]  ;;  %v666_v3 = vld [vmem:[#allocation9 + $0x30] sm:$0xff]  ;;  %v667_v4 = vld [vmem:[#allocation9 + $0x38] sm:$0xff]  ;;  %p2207_p12 = scmp.ne.s32.totalorder %s1386_s3, %s2206_s21  ;;  %p2212_p0 = scmp.lt.s32.totalorder %s2206_s21, %s2206_s21 }
  0x60   :  { %v217_v18 = vsub.f32 %v96_v2, %v119_v6  ;;  %v224_v19 = vsub.f32 %v97_v5, %v122_v9  ;;  %1822 = vmatprep.subr.bf16.mxu0 %v2353_v12  ;;  %v204_v23 = vand.u32 4294901760, %v203_v15  ;;  %v680_v41 = vand.u32 4294901760, %v661_v30 }
  0x61   :  { %v182_v21 = vsub.f32 %v107_v10, %v2355_v13  ;;  %v192_v22 = vsub.f32 %v110_v11, %v2357_v14  ;;  %1824 = vmatpush3.bf16.msra.mxu0 %v2353_v12  ;;  %v211_v24 = vand.u32 4294901760, %v210_v17  ;;  %v2371_v44 = vsub.f32 %v2361_v20, %v677_v31  ;;  %v668_v11 = vld [vmem:[#allocation9 + $0x40] sm:$0xff]  ;;  %v670_v20 = vld [vmem:[#allocation9 + $0x50] sm:$0xff]  ;;  %p2213_p1 = por %p2212_p0, %p2211_p13 }
  0x62   :  { %v218_v25 = vand.u32 4294901760, %v217_v18  ;;  %v225_v26 = vand.u32 4294901760, %v224_v19  ;;  %1826 = vmatprep.subr.bf16.mxu0 %v2359_v16  ;;  %v205_v29 = vsub.f32 %v203_v15, %v204_v23  ;;  %v2373_v47 = vsub.f32 %v661_v30, %v680_v41 }
  0x63   :  { %v183_v27 = vand.u32 4294901760, %v182_v21  ;;  %v193_v28 = vand.u32 4294901760, %v192_v22  ;;  %v212_v32 = vsub.f32 %v210_v17, %v211_v24  ;;  %v1837_v49 = vpack.c.bf16 %v210_v17, %v203_v15  ;;  %p2214_p2 = pnand %p2213_p1, %p2207_p12 }
  0x64   :  { %v219_v33 = vsub.f32 %v217_v18, %v218_v25  ;;  %v226_v34 = vsub.f32 %v224_v19, %v225_v26  ;;  %v206_v37 = vand.u32 4294901760, %v205_v29  ;;  %v1933_v48 = vpack.c.bf16 %v2373_v47, %v2371_v44  ;;  %v675_v29 = vld [vmem:[#allocation9 + $0x78] sm:$0xff] }
  0x65   :  { %v184_v35 = vsub.f32 %v182_v21, %v183_v27  ;;  %v194_v36 = vsub.f32 %v192_v22, %v193_v28  ;;  %1828 = vmatpush3.bf16.msra.mxu0 %v2359_v16  ;;  %v213_v38 = vand.u32 4294901760, %v212_v32  ;;  %v1841_v50 = vpack.c.bf16 %v224_v19, %v217_v18 }
  0x66   :  { %v220_v39 = vand.u32 4294901760, %v219_v33  ;;  %v227_v40 = vand.u32 4294901760, %v226_v34  ;;  %1934 = vmatprep.subr.bf16.mxu1 %v1933_v48  ;;  %v1853_v51 = vpack.c.bf16 %v211_v24, %v204_v23  ;;  %v1857_v52 = vpack.c.bf16 %v225_v26, %v218_v25  ;;  %v673_v26 = vld [vmem:[#allocation9 + $0x68] sm:$0xff] }
  0x67   :  { %v185_v42 = vand.u32 4294901760, %v184_v35  ;;  %v195_v43 = vand.u32 4294901760, %v194_v36  ;;  %v1829_v45 = vpack.c.bf16 %v213_v38, %v206_v37  ;;  %1936 = vmatpush3.bf16.msra.mxu1 %v1933_v48  ;;  %v2389_v53 = vpack.c.bf16 %v680_v41, %v677_v31 }
  0x68   :  { %v1833_v46 = vpack.c.bf16 %v227_v40, %v220_v39  ;;  %v683_v56 = vand.u32 4294901760, %v662_v54  ;;  %v686_v57 = vand.u32 4294901760, %v663_v55  ;;  %v689_v63 = vand.u32 4294901760, %v664_v60 }
  0x69   :  { %1553 = vmatprep.mubr.f32.mxu0 %v185_v42  ;;  %1830 = vmatprep.subr.bf16.mxu0 %v1829_v45  ;;  %v692_v0 = vand.u32 4294901760, %v665_v61  ;;  %v695_v6 = vand.u32 4294901760, %v666_v3  ;;  %v698_v7 = vand.u32 4294901760, %v667_v4  ;;  %v707_v24 = vand.u32 4294901760, %v670_v20 }
  0x6a   :  { %1554 = vmatmul.mubr.f32.vlgmr.msra.gmra.mrb[0].mxu0 %v195_v43  ;;  %v2395_v58 = vsub.f32 %v662_v54, %v683_v56  ;;  %v2397_v59 = vsub.f32 %v663_v55, %v686_v57  ;;  %v2401_v1 = vsub.f32 %v664_v60, %v689_v63  ;;  %v2407_v8 = vpack.c.bf16 %v686_v57, %v683_v56 }
  0x6b   :  { %1832 = vmatpush3.bf16.msra.mxu0 %v1829_v45  ;;  %1564 = vmatprep.mubr.f32.mxu0 %v2355_v13  ;;  %v2403_v2 = vsub.f32 %v665_v61, %v692_v0  ;;  %v2409_v9 = vsub.f32 %v666_v3, %v695_v6  ;;  %v2411_v10 = vsub.f32 %v667_v4, %v698_v7  ;;  %v716_v30 = vand.u32 4294901760, %v673_v26 }
  0x6c   :  { %1834 = vmatprep.subr.bf16.mxu0 %v1833_v46  ;;  %v1937_v62 = vpack.c.bf16 %v2397_v59, %v2395_v58  ;;  %v2423_v19 = vpack.c.bf16 %v698_v7, %v695_v6  ;;  %v722_v32 = vand.u32 4294901760, %v675_v29  ;;  %v2432_v34 = vsub.f32 %v670_v20, %v707_v24 }
  0x6d   :  { %v1941_v5 = vpack.c.bf16 %v2403_v2, %v2401_v1  ;;  %v2438_v37 = vsub.f32 %v673_v26, %v716_v30  ;;  %v780_v48 = vand.u32 4294901760, %v2371_v44  ;;  %v794_v55 = vand.u32 4294901760, %v2395_v58 }
  0x6e   :  { %1938 = vmatprep.subr.bf16.mxu1 %v1937_v62  ;;  %v2444_v40 = vsub.f32 %v675_v29, %v722_v32  ;;  %v801_v56 = vand.u32 4294901760, %v2397_v59 }
  0x6f   :  { %1836 = vmatpush3.bf16.msra.mxu0 %v1833_v46  ;;  %1940 = vmatpush3.bf16.msra.mxu1 %v1937_v62  ;;  %v795_v60 = vsub.f32 %v2395_v58, %v794_v55  ;;  %v822_v58 = vand.u32 4294901760, %v2409_v9 }
  0x70   :  { %1838 = vmatprep.subr.bf16.mxu0 %v1837_v49  ;;  %1942 = vmatprep.subr.bf16.mxu1 %v1941_v5  ;;  %v802_v61 = vsub.f32 %v2397_v59, %v801_v56  ;;  %v829_v59 = vand.u32 4294901760, %v2411_v10 }
  0x71   :  { %v796_v62 = vand.u32 4294901760, %v795_v60 }
  0x72   :  { %1565 = vmatmul.mubr.f32.vlgmr.msra.gmra.mrb[0].mxu0 %v2357_v14 }
  0x73   :  { %1840 = vmatpush3.bf16.msra.mxu0 %v1837_v49  ;;  %1575 = vmatprep.mubr.f32.mxu0 %v182_v21  ;;  %v671_v21 = vld [vmem:[#allocation9 + $0x58] sm:$0xff]  ;;  %v787_v49 = vand.u32 4294901760, %v2373_v47 }
  0x74   :  { %1842 = vmatprep.subr.bf16.mxu0 %v1841_v50  ;;  %1944 = vmatpush3.bf16.msra.mxu1 %v1941_v5  ;;  %v710_v25 = vand.u32 4294901760, %v671_v21 }
  0x76   :  { %v2434_v35 = vsub.f32 %v671_v21, %v710_v25  ;;  %v2449_v42 = vpack.c.bf16 %v710_v25, %v707_v24  ;;  %v850_v24 = vand.u32 4294901760, %v2432_v34 }
  0x77   :  { %1844 = vmatpush3.bf16.msra.mxu0 %v1841_v50  ;;  %v781_v50 = vsub.f32 %v2371_v44, %v780_v48  ;;  %v803_v44 = vand.u32 4294901760, %v802_v61  ;;  %v2521_v61 = vpack.c.bf16 %v829_v59, %v822_v58 }
  0x78   :  { %1846 = vmatprep.subr.bf16.mxu0 %v2353_v12  ;;  %v1953_v38 = vpack.c.bf16 %v2434_v35, %v2432_v34 }
  0x7a   :  { %1576 = vmatmul.mubr.f32.vlgmr.msra.gmra.mrb[0].mxu0 %v192_v22  ;;  %v672_v22 = vld [vmem:[#allocation9 + $0x60] sm:$0xff] }
  0x7b   :  { %1848 = vmatpush3.bf16.msra.mxu0 %v2353_v12  ;;  %1586 = vmatprep.mubr.f32.mxu0 %v183_v27  ;;  %v713_v27 = vand.u32 4294901760, %v672_v22 }
  0x7c   :  { %1850 = vmatprep.subr.bf16.mxu0 %v2359_v16 }
  0x7d   :  { %v2436_v36 = vsub.f32 %v672_v22, %v713_v27  ;;  %v2455_v45 = vpack.c.bf16 %v716_v30, %v713_v27 }
  0x7f   :  { %1852 = vmatpush3.bf16.msra.mxu0 %v2359_v16  ;;  %v1957_v41 = vpack.c.bf16 %v2438_v37, %v2436_v36  ;;  %v864_v29 = vand.u32 4294901760, %v2436_v36 }
  0x80   :  { %1854 = vmatprep.subr.bf16.mxu0 %v1853_v51 }
  0x82   :  { %1587 = vmatmul.mubr.f32.vlgmr.msra.gmra.mrb[0].mxu0 %v193_v28  ;;  %v674_v28 = vld [vmem:[#allocation9 + $0x70] sm:$0xff] }
  0x83   :  { %1856 = vmatpush3.bf16.msra.mxu0 %v1853_v51  ;;  %1597 = vmatprep.mubr.f32.mxu0 %v2355_v13  ;;  %v719_v31 = vand.u32 4294901760, %v674_v28  ;;  %v788_v51 = vsub.f32 %v2373_v47, %v787_v49  ;;  %v808_v47 = vand.u32 4294901760, %v2401_v1 }
  0x84   :  { %1858 = vmatprep.subr.bf16.mxu0 %v1857_v52 }
  0x85   :  { %v2442_v39 = vsub.f32 %v674_v28, %v719_v31  ;;  %v2459_v46 = vpack.c.bf16 %v722_v32, %v719_v31  ;;  %v789_v54 = vand.u32 4294901760, %v788_v51  ;;  %v809_v3 = vsub.f32 %v2401_v1, %v808_v47 }
  0x86   :  { %v2513_v51 = vpack.c.bf16 %v787_v49, %v780_v48 }
  0x87   :  { %1860 = vmatpush3.bf16.msra.mxu0 %v1857_v52  ;;  %v1961_v43 = vpack.c.bf16 %v2444_v40, %v2442_v39  ;;  %v782_v52 = vand.u32 4294901760, %v781_v50  ;;  %v810_v5 = vand.u32 4294901760, %v809_v3 }
  0x88   :  { %1862 = vmatprep.subr.bf16.mxu0 %v2353_v12 }
  0x89   :  { %v2472_v57 = vpack.c.bf16 %v789_v54, %v782_v52 }
  0x8a   :  { %1598 = vmatmul.mubr.f32.vlgmr.msra.gmra.mrb[0].mxu0 %v2357_v14 }
  0x8b   :  { %1864 = vmatpush3.bf16.msra.mxu0 %v2353_v12  ;;  %1608 = vmatprep.mubr.f32.mxu0 %v2355_v13  ;;  %v669_v12 = vld [vmem:[#allocation9 + $0x48] sm:$0xff]  ;;  %v1945_v13 = vpack.c.bf16 %v2411_v10, %v2409_v9 }
  0x8c   :  { %1866 = vmatprep.subr.bf16.mxu0 %v2359_v16  ;;  %v704_v15 = vand.u32 4294901760, %v669_v12 }
  0x8d   :  { %1946 = vmatprep.subr.bf16.mxu1 %v1945_v13 }
  0x8e   :  { %v2421_v18 = vsub.f32 %v669_v12, %v704_v15  ;;  %1948 = vmatpush3.bf16.msra.mxu1 %v1945_v13  ;;  %v830_v12 = vsub.f32 %v2411_v10, %v829_v59  ;;  %v851_v10 = vsub.f32 %v2432_v34, %v850_v24  ;;  %v885_v34 = vand.u32 4294901760, %v2444_v40 }
  0x8f   :  { %1868 = vmatpush3.bf16.msra.mxu0 %v2359_v16  ;;  %v2417_v16 = vpack.c.bf16 %v692_v0, %v689_v63  ;;  %v815_v63 = vand.u32 4294901760, %v2403_v2  ;;  %v2479_v0 = vpack.c.bf16 %v803_v44, %v796_v62 }
  0x90   :  { %1870 = vmatprep.subr.bf16.mxu0 %v2389_v53  ;;  %v843_v1 = vand.u32 4294901760, %v2421_v18  ;;  %v852_v27 = vand.u32 4294901760, %v851_v10  ;;  %v886_v50 = vsub.f32 %v2444_v40, %v885_v34  ;;  %v1399_v40 = vld [vmem:[#allocation8] ss:$0 sm:$0xff] }
  0x91   :  { %v816_v4 = vsub.f32 %v2403_v2, %v815_v63 }
  0x92   :  { %1609 = vmatmul.mubr.f32.vlgmr.msra.gmra.mrb[0].mxu0 %v2357_v14  ;;  %v701_v14 = vand.u32 4294901760, %v668_v11  ;;  %v844_v21 = vsub.f32 %v2421_v18, %v843_v1  ;;  %v887_v54 = vand.u32 4294901760, %v886_v50 }
  0x93   :  { %1872 = vmatpush3.bf16.msra.mxu0 %v2389_v53  ;;  %v817_v6 = vand.u32 4294901760, %v816_v4 }
  0x94   :  { %1874 = vmatprep.subr.bf16.mxu0 %v2407_v8  ;;  %v2419_v17 = vsub.f32 %v668_v11, %v701_v14  ;;  %v2429_v33 = vpack.c.bf16 %v704_v15, %v701_v14  ;;  %v823_v11 = vsub.f32 %v2409_v9, %v822_v58  ;;  %v831_v14 = vand.u32 4294901760, %v830_v12 }
  0x95   :  { %v2485_v7 = vpack.c.bf16 %v817_v6, %v810_v5  ;;  %v857_v9 = vand.u32 4294901760, %v2434_v35 }
  0x96   :  { %v1949_v23 = vpack.c.bf16 %v2421_v18, %v2419_v17  ;;  %v824_v13 = vand.u32 4294901760, %v823_v11  ;;  %v836_v15 = vand.u32 4294901760, %v2419_v17  ;;  %v865_v18 = vsub.f32 %v2436_v36, %v864_v29 }
  0x97   :  { %1876 = vmatpush3.bf16.msra.mxu0 %v2407_v8  ;;  %v858_v26 = vsub.f32 %v2434_v35, %v857_v9  ;;  %v2517_v36 = vpack.c.bf16 %v801_v56, %v794_v55  ;;  %v2525_v44 = vpack.c.bf16 %v857_v9, %v850_v24 }
  0x98   :  { %1878 = vmatprep.subr.bf16.mxu0 %v2417_v16  ;;  %1950 = vmatprep.subr.bf16.mxu1 %v1949_v23  ;;  %v2491_v20 = vpack.c.bf16 %v831_v14, %v824_v13  ;;  %v837_v2 = vsub.f32 %v2419_v17, %v836_v15  ;;  %v871_v17 = vand.u32 4294901760, %v2438_v37  ;;  %v866_v32 = vand.u32 4294901760, %v865_v18 }
  0x99   :  { %1952 = vmatpush3.bf16.msra.mxu1 %v1949_v23  ;;  %v845_v23 = vand.u32 4294901760, %v844_v21  ;;  %v859_v28 = vand.u32 4294901760, %v858_v26  ;;  %v2523_v62 = vpack.c.bf16 %v843_v1, %v836_v15 }
  0x9a   :  { %1954 = vmatprep.subr.bf16.mxu1 %v1953_v38  ;;  %v838_v22 = vand.u32 4294901760, %v837_v2  ;;  %v872_v31 = vsub.f32 %v2438_v37, %v871_v17  ;;  %v2519_v37 = vpack.c.bf16 %v815_v63, %v808_v47  ;;  %v2527_v3 = vpack.c.bf16 %v871_v17, %v864_v29 }
  0x9b   :  { %1880 = vmatpush3.bf16.msra.mxu0 %v2417_v16  ;;  %v2503_v30 = vpack.c.bf16 %v859_v28, %v852_v27 }
  0x9c   :  { %1882 = vmatprep.subr.bf16.mxu0 %v2423_v19  ;;  %v2497_v25 = vpack.c.bf16 %v845_v23, %v838_v22 }
  0x9d   :  { %1956 = vmatpush3.bf16.msra.mxu1 %v1953_v38  ;;  %v873_v38 = vand.u32 4294901760, %v872_v31 }
  0x9e   :  { %1958 = vmatprep.subr.bf16.mxu1 %v1957_v41 }
  0x9f   :  { %1884 = vmatpush3.bf16.msra.mxu0 %v2423_v19 }
  0xa0   :  { %1886 = vmatprep.subr.bf16.mxu0 %v2429_v33 }
  0xa1   :  { %1960 = vmatpush3.bf16.msra.mxu1 %v1957_v41  ;;  %v878_v41 = vand.u32 4294901760, %v2442_v39 }
  0xa2   :  { %1962 = vmatprep.subr.bf16.mxu1 %v1961_v43 }
  0xa3   :  { %1888 = vmatpush3.bf16.msra.mxu0 %v2429_v33  ;;  %v879_v35 = vsub.f32 %v2442_v39, %v878_v41  ;;  %v2529_v39 = vpack.c.bf16 %v885_v34, %v878_v41 }
  0xa4   :  { %1890 = vmatprep.subr.bf16.mxu0 %v2449_v42 }
  0xa5   :  { %1964 = vmatpush3.bf16.msra.mxu1 %v1961_v43  ;;  %v2509_v43 = vpack.c.bf16 %v873_v38, %v866_v32  ;;  %v880_v52 = vand.u32 4294901760, %v879_v35 }
  0xa6   :  { %1966 = vmatprep.subr.bf16.mxu1 %v2389_v53 }
  0xa7   :  { %1892 = vmatpush3.bf16.msra.mxu0 %v2449_v42  ;;  %v2515_v60 = vpack.c.bf16 %v887_v54, %v880_v52 }
  0xa8   :  { %1894 = vmatprep.subr.bf16.mxu0 %v2455_v45 }
  0xab   :  { %1896 = vmatpush3.bf16.msra.mxu0 %v2455_v45 }
  0xac   :  { %1898 = vmatprep.subr.bf16.mxu0 %v2459_v46 }
  0xaf   :  { %1900 = vmatpush3.bf16.msra.mxu0 %v2459_v46 }
  0xb0   :  { %1902 = vmatprep.subr.bf16.mxu0 %v2472_v57 }
 0x165   :  { %v1610_v48 = vpop.f32.mrb[0].mxu0 }
 0x166   :  { %v2061_v49 = vadd.f32 %v1610_v48, %v1399_v40  ;;  %v630_v4 = vpop.f32.mrb[1].mxu0 }
 0x167   :  { %v2062_v5 = vadd.f32 %v1399_v40, %v630_v4 }
 0x168   :  { %v643_v6 = vmul.f32 %v2061_v49, %v2061_v49  ;;  %v641_v63 = vmul.f32 0.7978846, %v2061_v49  ;;  %v651_v1 = vmul.f32 0.5, %v2061_v49 }
 0x169   :  { %v642_v55 = vmul.f32 %v2062_v5, %v2062_v5  ;;  %v640_v59 = vmul.f32 0.7978846, %v2062_v5  ;;  %v650_v21 = vmul.f32 0.5, %v2062_v5 }
 0x16a   :  { %v645_v56 = vmul.f32 0.044715, %v643_v6 }
 0x16b   :  { %v644_v47 = vmul.f32 0.044715, %v642_v55 }
 0x16c   :  { %v647_v58 = vadd.f32 1.0, %v645_v56 }
 0x16d   :  { %v646_v11 = vadd.f32 1.0, %v644_v47 }
 0x16e   :  { %v649_v12 = vmul.f32 %v647_v58, %v641_v63 }
 0x16f   :  { %v648_v13 = vmul.f32 %v646_v11, %v640_v59 }
 0x170   :  { %2092 = vtanh.f32 %v649_v12 }
 0x171   :  { %2094 = vtanh.f32 %v648_v13 }
 0x17a   :  { %v2093_v14 = vpop.eup %2092 }
 0x17b   :  { %v2095_v15 = vpop.eup %2094  ;;  %v655_v2 = vadd.f32 1.0, %v2093_v14 }
 0x17c   :  { %v654_v22 = vadd.f32 1.0, %v2095_v15 }
 0x17d   :  { %v657_v23 = vmul.f32 %v655_v2, %v651_v1 }
 0x17e   :  { %v656_v24 = vmul.f32 %v654_v22, %v650_v21 }
 0x17f   :  { %v2531_v9 = vand.u32 4294901760, %v657_v23 }
 0x180   :  { %v2533_v10 = vand.u32 4294901760, %v656_v24 }
 0x181   :  { %v768_v26 = vsub.f32 %v657_v23, %v2531_v9 }
 0x182   :  { %v758_v27 = vsub.f32 %v656_v24, %v2533_v10 }
 0x183   :  { %v769_v28 = vand.u32 4294901760, %v768_v26 }
 0x184   :  { %1713 = vmatprep.mubr.f32.mxu1 %v758_v27  ;;  %v759_v29 = vand.u32 4294901760, %v758_v27 }
 0x185   :  { %1714 = vmatmul.mubr.f32.vlgmr.msra.gmra.mrb[0].mxu1 %v768_v26  ;;  %v770_v17 = vsub.f32 %v768_v26, %v769_v28 }
 0x186   :  { %1968 = vmatpush3.bf16.msra.mxu1 %v2389_v53  ;;  %1748 = vmatprep.mubr.f32.mxu1 %v759_v29  ;;  %v760_v18 = vsub.f32 %v758_v27, %v759_v29 }
 0x187   :  { %1970 = vmatprep.subr.bf16.mxu1 %v2407_v8  ;;  %v771_v32 = vand.u32 4294901760, %v770_v17 }
 0x188   :  { %v761_v31 = vand.u32 4294901760, %v760_v18 }
 0x18a   :  { %1972 = vmatpush3.bf16.msra.mxu1 %v2407_v8  ;;  %1643 = vmatprep.mubr.f32.mxu0 %v761_v31 }
 0x18b   :  { %1644 = vmatmul.mubr.f32.vlgmr.msra.gmra.mrb[2].mxu0 %v771_v32  ;;  %1974 = vmatprep.subr.bf16.mxu1 %v2417_v16 }
 0x18c   :  { %1904 = vmatpush3.bf16.msra.mxu0 %v2472_v57  ;;  %1678 = vmatprep.mubr.f32.mxu0 %v2533_v10 }
 0x18d   :  { %1906 = vmatprep.subr.bf16.mxu0 %v2479_v0 }
 0x18e   :  { %1976 = vmatpush3.bf16.msra.mxu1 %v2417_v16 }
 0x18f   :  { %1978 = vmatprep.subr.bf16.mxu1 %v2423_v19 }
 0x190   :  { %1908 = vmatpush3.bf16.msra.mxu0 %v2479_v0 }
 0x191   :  { %1910 = vmatprep.subr.bf16.mxu0 %v2485_v7 }
 0x192   :  { %1980 = vmatpush3.bf16.msra.mxu1 %v2423_v19 }
 0x193   :  { %1982 = vmatprep.subr.bf16.mxu1 %v2429_v33 }
 0x194   :  { %1912 = vmatpush3.bf16.msra.mxu0 %v2485_v7 }
 0x195   :  { %1914 = vmatprep.subr.bf16.mxu0 %v2491_v20 }
 0x196   :  { %1984 = vmatpush3.bf16.msra.mxu1 %v2429_v33 }
 0x197   :  { %1986 = vmatprep.subr.bf16.mxu1 %v2449_v42 }
 0x198   :  { %1916 = vmatpush3.bf16.msra.mxu0 %v2491_v20 }
 0x199   :  { %1918 = vmatprep.subr.bf16.mxu0 %v2497_v25 }
 0x19a   :  { %1988 = vmatpush3.bf16.msra.mxu1 %v2449_v42 }
 0x19b   :  { %1990 = vmatprep.subr.bf16.mxu1 %v2455_v45 }
 0x19c   :  { %1920 = vmatpush3.bf16.msra.mxu0 %v2497_v25 }
 0x19d   :  { %1922 = vmatprep.subr.bf16.mxu0 %v2503_v30 }
 0x19e   :  { %1992 = vmatpush3.bf16.msra.mxu1 %v2455_v45 }
 0x19f   :  { %1994 = vmatprep.subr.bf16.mxu1 %v2459_v46 }
 0x1a0   :  { %1924 = vmatpush3.bf16.msra.mxu0 %v2503_v30 }
 0x1a1   :  { %1926 = vmatprep.subr.bf16.mxu0 %v2509_v43 }
 0x1a2   :  { %1996 = vmatpush3.bf16.msra.mxu1 %v2459_v46 }
 0x1a3   :  { %1998 = vmatprep.subr.bf16.mxu1 %v2513_v51 }
 0x1a4   :  { %1928 = vmatpush3.bf16.msra.mxu0 %v2509_v43 }
 0x1a5   :  { %1749 = vmatmul.mubr.f32.vlgmr.msra.gmra.mrb[0].mxu1 %v769_v28  ;;  %1930 = vmatprep.subr.bf16.mxu0 %v2515_v60 }
 0x1a6   :  { %2000 = vmatpush3.bf16.msra.mxu1 %v2513_v51  ;;  %1783 = vmatprep.mubr.f32.mxu1 %v2533_v10 }
 0x1a7   :  { %2002 = vmatprep.subr.bf16.mxu1 %v2517_v36 }
 0x1a8   :  { %1932 = vmatpush3.bf16.msra.mxu0 %v2515_v60 }
 0x1aa   :  { %2004 = vmatpush3.bf16.msra.mxu1 %v2517_v36 }
 0x1ab   :  { %1679 = vmatmul.mubr.f32.vlgmr.msra.gmra.mrb[2].mxu0 %v2531_v9  ;;  %2006 = vmatprep.subr.bf16.mxu1 %v2519_v37 }
 0x1ae   :  { %2008 = vmatpush3.bf16.msra.mxu1 %v2519_v37 }
 0x1af   :  { %2010 = vmatprep.subr.bf16.mxu1 %v2521_v61 }
 0x1b2   :  { %2012 = vmatpush3.bf16.msra.mxu1 %v2521_v61 }
 0x1b3   :  { %2014 = vmatprep.subr.bf16.mxu1 %v2523_v62 }
 0x1b6   :  { %2016 = vmatpush3.bf16.msra.mxu1 %v2523_v62 }
 0x1b7   :  { %2018 = vmatprep.subr.bf16.mxu1 %v2525_v44 }
 0x1ba   :  { %2020 = vmatpush3.bf16.msra.mxu1 %v2525_v44 }
 0x1bb   :  { %2022 = vmatprep.subr.bf16.mxu1 %v2527_v3 }
 0x1be   :  { %2024 = vmatpush3.bf16.msra.mxu1 %v2527_v3 }
 0x1bf   :  { %2026 = vmatprep.subr.bf16.mxu1 %v2529_v39 }
 0x1c2   :  { %2028 = vmatpush3.bf16.msra.mxu1 %v2529_v39 }
 0x1c3   :  { %2030 = vmatprep.subr.bf16.mxu1 %v2389_v53 }
 0x1c5   :  { %1784 = vmatmul.mubr.f32.vlgmr.msra.gmra.mrb[0].mxu1 %v2531_v9 }
 0x1c6   :  { %2032 = vmatpush3.bf16.msra.mxu1 %v2389_v53  ;;  %1818 = vmatprep.mubr.f32.mxu1 %v2533_v10  ;;  %v2243_v53 = vmov 0.0  }
 0x1c7   :  { %2034 = vmatprep.subr.bf16.mxu1 %v2407_v8  ;;  %91 = vst.msk [vmem:[#allocation2 + $0x8] sm:$0xff] %vm89_vm0, %v2243_v53  ;;  %90 = vst.msk [vmem:[#allocation2] sm:$0xff] %vm89_vm0, %v2243_v53 }
 0x1ca   :  { %2036 = vmatpush3.bf16.msra.mxu1 %v2407_v8 }
 0x1cb   :  { %2038 = vmatprep.subr.bf16.mxu1 %v2417_v16 }
 0x1ce   :  { %2040 = vmatpush3.bf16.msra.mxu1 %v2417_v16  ;;  %v658_v57 = vld [vmem:[#allocation2] sm:$0xff] }
 0x1cf   :  { %2042 = vmatprep.subr.bf16.mxu1 %v2423_v19 }
 0x1d2   :  { %2044 = vmatpush3.bf16.msra.mxu1 %v2423_v19  ;;  %v659_v19 = vld [vmem:[#allocation2 + $0x8] sm:$0xff] }
 0x1d3   :  { %2046 = vmatprep.subr.bf16.mxu1 %v2429_v33 }
 0x1d6   :  { %2048 = vmatpush3.bf16.msra.mxu1 %v2429_v33 }
 0x1d7   :  { %2050 = vmatprep.subr.bf16.mxu1 %v2449_v42 }
 0x1da   :  { %2052 = vmatpush3.bf16.msra.mxu1 %v2449_v42 }
 0x1db   :  { %2054 = vmatprep.subr.bf16.mxu1 %v2455_v45 }
 0x1de   :  { %2056 = vmatpush3.bf16.msra.mxu1 %v2455_v45 }
 0x1df   :  { %2058 = vmatprep.subr.bf16.mxu1 %v2459_v46 }
 0x1e2   :  { %2060 = vmatpush3.bf16.msra.mxu1 %v2459_v46  ;;  %v1400_v46 = vld [vmem:[#allocation11] ss:$0 sm:$0xff] }
 0x1e5   :  { %1819 = vmatmul.mubr.f32.vlgmr.msra.gmra.mrb[0].mxu1 %v2531_v9 }
 0x27e   :  { %v1680_v8 = vpop.f32.mrb[2].mxu0 }
 0x27f   :  { %v924_v16 = vpop.f32.mrb[3].mxu0 }
 0x2b8   :  { %v1820_v33 = vpop.f32.mrb[0].mxu1 }
 0x2b9   :  { %v2063_v42 = vadd.f32 %v1820_v33, %v1680_v8  ;;  %v1350_v0 = vpop.f32.mrb[1].mxu1 }
 0x2ba   :  { %v2064_v7 = vadd.f32 %v1350_v0, %v924_v16 }
 0x2bb   :  { %v1361_v45 = vadd.f32 %v2063_v42, %v659_v19 }
 0x2bc   :  { %v1360_v20 = vadd.f32 %v2064_v7, %v658_v57 }
 0x2bd   :  { %1363 = vst.msk [vmem:[#allocation2 + $0x8] sm:$0xff] %vm89_vm0, %v1361_v45 }
 0x2be   :  { %1362 = vst.msk [vmem:[#allocation2] sm:$0xff] %vm89_vm0, %v1360_v20 }
 0x2c4   :  { %v1368_v25 = vld [vmem:[#allocation2 + $0x8] sm:$0xff] }
 0x2c5   :  { %v1367_v30 = vld [vmem:[#allocation2] sm:$0xff]  ;;  %v1377_v38 = vadd.f32 %v1400_v46, %v1368_v25 }
 0x2c6   :  { %v1376_v41 = vadd.f32 %v1400_v46, %v1367_v30 }
 0x2c7   :  { %1379 = vst.msk [vmem:[#allocation12 + $0x8] sm:$0xff] %vm89_vm0, %v1377_v38 }
 0x2c8   :  { %1378 = vst.msk [vmem:[#allocation12] sm:$0xff] %vm89_vm0, %v1376_v41 }
 0x2c9   :  { %2217 = shalt.err (!%p2214_p2)
}
 0x2ca   :  { %s2218_s9 = scalar_lea.hbm %s2631_s5, 256 }
 0x2cb   :  { %p2219_p3 = scmp.ne.s32.totalorder %s2631_s5, %s2218_s9  ;;  %p2222_p4 = scmp.lt.u32.totalorder %s2218_s9, %s2631_s5 }
 0x2cd   :  { %p2224_p5 = pnand %p2222_p4, %p2219_p3 }
 0x2cf   :  { %2227 = shalt.err (!%p2224_p5)
}
 0x2d0   :  { %1391 = dma.vmem_to_hbm [thread:$0]  %s1386_s3, 256, %s2631_s5, [#allocation5], %s2238_s30, %s2238_s30, %s2239_s6  }
 0x2d1   :  { %2234 = dma.done.wait [#allocation5], 256  }
 0x2d2   :  { %2235 = vsyncadd [#allocation5], 4294967040 }
 0x2d3   :  { %1395 = vsyncpa [#allocation4], 1 }
 0x2d4   :  { %1396 = vsyncpa [#allocation7], 1 }
 0x2d5   :  { %1397 = vsyncpa [#allocation10], 1 }
 0x2d6   :  { %1398 = vsyncpa [#allocation5], 1 }

</bundles_post_ra>
